<compile_context>
chip_gen: v6e
topology: v6e:2x2x1
jax: 0.10.0
libtpu: 0.0.40
codegen_flags: <defaults>
</compile_context>

<pallas_src>
import functools
import math

import jax
import jax.numpy as jnp
from jax import lax
from jax.experimental import pallas as pl
from jax.experimental.pallas import tpu as pltpu


def _layer_norm(x, gamma, beta, eps=1e-5):
    # Single-pass statistics: var = E[x^2] - mean^2 (two independent reductions).
    m = jnp.mean(x, axis=-1, keepdims=True)
    m2 = jnp.mean(x * x, axis=-1, keepdims=True)
    var = m2 - m * m
    return (x - m) * lax.rsqrt(var + eps) * gamma + beta


def encoder_block_kernel(
    x_ref, mask_ref,
    wq_ref, bq_ref, wk_ref, bk_ref, wv_ref, bv_ref, wo_ref, bo_ref,
    g1_ref, be1_ref, g2_ref, be2_ref,
    w1_ref, b1_ref, w2_ref, b2_ref,
    o_ref, *, num_heads,
):
    f32 = jnp.float32
    bf16 = jnp.bfloat16

    x = x_ref[...]                                    # (S, D) f32 (batch dim squeezed)
    S, D = x.shape
    dk = D // num_heads
    scale = 1.0 / math.sqrt(dk)

    # Additive padding-mask bias, computed once (hoisted out of the head loop).
    mask = mask_ref[...]                              # (1, S)
    mask_bias = jnp.where(mask == 0, -1e9, 0.0).astype(f32)

    # ---- residual1: x + MHA(LN1(x)) ------------------------------------------------
    xn = _layer_norm(x, g1_ref[...], be1_ref[...])    # f32
    xn_b = xn.astype(bf16)                            # bf16 into the MXU, f32 accumulate
    q = jnp.dot(xn_b, wq_ref[...], preferred_element_type=f32) + bq_ref[...]
    q = q * scale                                     # fold 1/sqrt(dk) into q once
    k = jnp.dot(xn_b, wk_ref[...], preferred_element_type=f32) + bk_ref[...]
    v = jnp.dot(xn_b, wv_ref[...], preferred_element_type=f32) + bv_ref[...]
    q = q.astype(bf16)
    k = k.astype(bf16)
    v = v.astype(bf16)

    attn = jnp.zeros((S, D), f32)
    for h in range(num_heads):                        # static unroll over heads
        qh = q[:, h * dk:(h + 1) * dk]                # (S, dk)
        kh = k[:, h * dk:(h + 1) * dk]
        vh = v[:, h * dk:(h + 1) * dk]
        # scores = qh @ kh^T without materializing a transpose (contract last dims).
        s = lax.dot_general(qh, kh, (((1,), (1,)), ((), ())),
                            preferred_element_type=f32)            # (S, S) f32
        s = s + mask_bias                                           # broadcast over rows
        s = s - jnp.max(s, axis=-1, keepdims=True)
        p = jnp.exp(s)
        p = p * pl.reciprocal(jnp.sum(p, axis=-1, keepdims=True), approx=True)
        ph = jnp.dot(p.astype(bf16), vh, preferred_element_type=f32)  # (S, dk)
        # concat(heads) @ wo  ==  sum_h head_h @ wo[h]   (wo passed as (H, dk, D))
        attn = attn + jnp.dot(ph.astype(bf16), wo_ref[h], preferred_element_type=f32)
    attn = attn + bo_ref[...]
    h1 = x + attn                                     # dropout(p=0) is identity

    # ---- residual2: h1 + FFN(LN2(h1)) ----------------------------------------------
    hn = _layer_norm(h1, g2_ref[...], be2_ref[...])
    ff = jnp.dot(hn.astype(bf16), w1_ref[...], preferred_element_type=f32) + b1_ref[...]
    ff = jnp.maximum(ff, 0.0)
    ff = jnp.dot(ff.astype(bf16), w2_ref[...], preferred_element_type=f32) + b2_ref[...]
    o_ref[...] = (h1 + ff).astype(o_ref.dtype)


def encoder_block(x, mask, params, *, num_heads):
    B, S, D = x.shape
    Dff = params["w1"].shape[1]
    dk = D // num_heads
    bf16 = jnp.bfloat16

    # Weights go to bf16 (MXU-native, half the VMEM footprint). Biases/LN params stay f32
    # (they are added after the f32 accumulation / used in f32 elementwise math).
    wq = params["wq"].astype(bf16)
    wk = params["wk"].astype(bf16)
    wv = params["wv"].astype(bf16)
    wo = params["wo"].reshape(num_heads, dk, D).astype(bf16)   # per-head row blocks
    w1 = params["w1"].astype(bf16)
    w2 = params["w2"].astype(bf16)

    def full(shape):
        return pl.BlockSpec(shape, lambda b, _n=len(shape): (0,) * _n)

    in_specs = [
        pl.BlockSpec((None, S, D), lambda b: (b, 0, 0)),   # x      (batch squeezed)
        pl.BlockSpec((None, 1, S), lambda b: (b, 0, 0)),   # mask   (batch squeezed)
        full((D, D)), full((1, D)),                        # wq, bq
        full((D, D)), full((1, D)),                        # wk, bk
        full((D, D)), full((1, D)),                        # wv, bv
        full((num_heads, dk, D)), full((1, D)),            # wo (H, dk, D), bo
        full((1, D)), full((1, D)),                        # ln1 gamma, beta
        full((1, D)), full((1, D)),                        # ln2 gamma, beta
        full((D, Dff)), full((1, Dff)),                    # ffn w1, b1
        full((Dff, D)), full((1, D)),                      # ffn w2, b2
    ]

    # Advisory cost estimate for the XLA scheduler.
    flops = B * (
        2 * S * D * D * 4            # q/k/v/out projections
        + 2 * S * S * D * 2          # QK^T and PV across all heads
        + 2 * S * D * Dff * 2        # FFN
    )
    transcendentals = B * (num_heads * S * S + 2 * S)      # softmax exp + LN rsqrt
    bytes_accessed = (
        2 * B * S * D * 4 + B * S * 4                       # x in, out, mask
        + (4 * D * D + 2 * D * Dff) * 2                     # bf16 weights
        + (6 * D + Dff + 4 * D) * 4                         # biases / LN params
    )

    kernel = functools.partial(encoder_block_kernel, num_heads=num_heads)
    return pl.pallas_call(
        kernel,
        out_shape=jax.ShapeDtypeStruct((B, S, D), jnp.float32),
        grid=(B,),
        in_specs=in_specs,
        out_specs=pl.BlockSpec((None, S, D), lambda b: (b, 0, 0)),
        compiler_params=pltpu.CompilerParams(
            dimension_semantics=("parallel",),
            vmem_limit_bytes=48 * 1024 * 1024,
        ),
        cost_estimate=pl.CostEstimate(
            flops=flops, transcendentals=transcendentals, bytes_accessed=bytes_accessed
        ),
    )(
        x, mask,
        wq, params["bq"], wk, params["bk"],
        wv, params["bv"], wo, params["bo"],
        params["g1"], params["be1"], params["g2"], params["be2"],
        w1, params["b1"], w2, params["b2"],
    )


def encoder_block_ref(x, mask, p, *, num_heads):
    """Pure-JAX f32 reference mirroring the PyTorch forward."""
    def ln(t, g, b):
        m = t.mean(-1, keepdims=True)
        v = ((t - m) ** 2).mean(-1, keepdims=True)
        return (t - m) / jnp.sqrt(v + 1e-5) * g + b

    B, S, D = x.shape
    dk = D // num_heads
    xn = ln(x, p["g1"], p["be1"])
    q = xn @ p["wq"] + p["bq"]
    k = xn @ p["wk"] + p["bk"]
    v = xn @ p["wv"] + p["bv"]
    q = q.reshape(B, S, num_heads, dk).transpose(0, 2, 1, 3)
    k = k.reshape(B, S, num_heads, dk).transpose(0, 2, 1, 3)
    v = v.reshape(B, S, num_heads, dk).transpose(0, 2, 1, 3)
    s = jnp.einsum("bhqd,bhkd->bhqk", q, k) / math.sqrt(dk)
    s = jnp.where(mask[:, :, None, :] == 0, -1e9, s)          # masked_fill semantics
    pr = jax.nn.softmax(s, axis=-1)
    o = jnp.einsum("bhqk,bhkd->bhqd", pr, v).transpose(0, 2, 1, 3).reshape(B, S, D)
    h1 = x + o @ p["wo"] + p["bo"]
    hn = ln(h1, p["g2"], p["be2"])
    ff = jnp.maximum(hn @ p["w1"] + p["b1"], 0.0) @ p["w2"] + p["b2"]
    return h1 + ff


def make_params(key, D, Dff):
    ks = jax.random.split(key, 12)
    w = lambda k, s: jax.random.normal(k, s, jnp.float32) * 0.02
    return {
        "wq": w(ks[0], (D, D)),  "bq": w(ks[1], (1, D)),
        "wk": w(ks[2], (D, D)),  "bk": w(ks[3], (1, D)),
        "wv": w(ks[4], (D, D)),  "bv": w(ks[5], (1, D)),
        "wo": w(ks[6], (D, D)),  "bo": w(ks[7], (1, D)),
        "g1": jnp.ones((1, D), jnp.float32), "be1": jnp.zeros((1, D), jnp.float32),
        "g2": jnp.ones((1, D), jnp.float32), "be2": jnp.zeros((1, D), jnp.float32),
        "w1": w(ks[8], (D, Dff)), "b1": w(ks[9], (1, Dff)),
        "w2": w(ks[10], (Dff, D)), "b2": w(ks[11], (1, D)),
    }


if __name__ == "__main__":
    B, S, D, H, Dff = 2, 8, 32, 4, 64

    key = jax.random.PRNGKey(0)
    k_x, k_p = jax.random.split(key)
    x = jax.random.normal(k_x, (B, S, D), jnp.float32)
    params = make_params(k_p, D, Dff)

    # Padding mask (B, 1, S): batch 1 has its last two tokens padded.
    mask = jnp.ones((B, 1, S), jnp.float32)
    mask = mask.at[1, 0, S - 2:].set(0.0)

    out = encoder_block(x, mask, params, num_heads=H)
    out = jax.block_until_ready(out)

    ref = encoder_block_ref(x, mask, params, num_heads=H)
    assert out.shape == (B, S, D)
    # bf16 MXU inputs + approx reciprocal vs full-f32 reference: ~1e-3 absolute error here.
    assert jnp.allclose(out, ref, rtol=1e-2, atol=1e-2), "mismatch vs JAX reference"

    print("KERNEL_OK")
</pallas_src>

<mosaic_0001>
module attributes {stable_mosaic.version = 11 : i64} {
  func.func @encoder_block_kernel(%arg0: i32, %arg1: memref<1x8x32xf32, #tpu.memory_space<vmem>>, %arg2: memref<1x1x8xf32, #tpu.memory_space<vmem>>, %arg3: memref<32x32xbf16, #tpu.memory_space<vmem>>, %arg4: memref<1x32xf32, #tpu.memory_space<vmem>>, %arg5: memref<32x32xbf16, #tpu.memory_space<vmem>>, %arg6: memref<1x32xf32, #tpu.memory_space<vmem>>, %arg7: memref<32x32xbf16, #tpu.memory_space<vmem>>, %arg8: memref<1x32xf32, #tpu.memory_space<vmem>>, %arg9: memref<4x8x32xbf16, #tpu.memory_space<vmem>>, %arg10: memref<1x32xf32, #tpu.memory_space<vmem>>, %arg11: memref<1x32xf32, #tpu.memory_space<vmem>>, %arg12: memref<1x32xf32, #tpu.memory_space<vmem>>, %arg13: memref<1x32xf32, #tpu.memory_space<vmem>>, %arg14: memref<1x32xf32, #tpu.memory_space<vmem>>, %arg15: memref<32x64xbf16, #tpu.memory_space<vmem>>, %arg16: memref<1x64xf32, #tpu.memory_space<vmem>>, %arg17: memref<64x32xbf16, #tpu.memory_space<vmem>>, %arg18: memref<1x32xf32, #tpu.memory_space<vmem>>, %arg19: memref<1x8x32xf32, #tpu.memory_space<vmem>>) attributes {dimension_semantics = [#tpu.dimension_semantics<parallel>], iteration_bounds = array<i64: 2>, scalar_prefetch = 0 : i64, scratch_operands = 0 : i64, tpu.core_type = #tpu.core_type<tc>, window_params = [{transform_indices = @transform_0, window_bounds = array<i64: 1, 8, 32>}, {transform_indices = @transform_1, window_bounds = array<i64: 1, 1, 8>}, {pipeline_mode = #tpu.pipeline_mode<synchronous>, transform_indices = @transform_2, window_bounds = array<i64: 32, 32>}, {pipeline_mode = #tpu.pipeline_mode<synchronous>, transform_indices = @transform_3, window_bounds = array<i64: 1, 32>}, {pipeline_mode = #tpu.pipeline_mode<synchronous>, transform_indices = @transform_4, window_bounds = array<i64: 32, 32>}, {pipeline_mode = #tpu.pipeline_mode<synchronous>, transform_indices = @transform_5, window_bounds = array<i64: 1, 32>}, {pipeline_mode = #tpu.pipeline_mode<synchronous>, transform_indices = @transform_6, window_bounds = array<i64: 32, 32>}, {pipeline_mode = #tpu.pipeline_mode<synchronous>, transform_indices = @transform_7, window_bounds = array<i64: 1, 32>}, {pipeline_mode = #tpu.pipeline_mode<synchronous>, transform_indices = @transform_8, window_bounds = array<i64: 4, 8, 32>}, {pipeline_mode = #tpu.pipeline_mode<synchronous>, transform_indices = @transform_9, window_bounds = array<i64: 1, 32>}, {pipeline_mode = #tpu.pipeline_mode<synchronous>, transform_indices = @transform_10, window_bounds = array<i64: 1, 32>}, {pipeline_mode = #tpu.pipeline_mode<synchronous>, transform_indices = @transform_11, window_bounds = array<i64: 1, 32>}, {pipeline_mode = #tpu.pipeline_mode<synchronous>, transform_indices = @transform_12, window_bounds = array<i64: 1, 32>}, {pipeline_mode = #tpu.pipeline_mode<synchronous>, transform_indices = @transform_13, window_bounds = array<i64: 1, 32>}, {pipeline_mode = #tpu.pipeline_mode<synchronous>, transform_indices = @transform_14, window_bounds = array<i64: 32, 64>}, {pipeline_mode = #tpu.pipeline_mode<synchronous>, transform_indices = @transform_15, window_bounds = array<i64: 1, 64>}, {pipeline_mode = #tpu.pipeline_mode<synchronous>, transform_indices = @transform_16, window_bounds = array<i64: 64, 32>}, {pipeline_mode = #tpu.pipeline_mode<synchronous>, transform_indices = @transform_17, window_bounds = array<i64: 1, 32>}, {transform_indices = @transform_18, window_bounds = array<i64: 1, 8, 32>}]} {
    %c0 = arith.constant 0 : index
    %c0_0 = arith.constant 0 : index
    %c0_1 = arith.constant 0 : index
    %0 = vector.load %arg1[%c0, %c0_0, %c0_1] : memref<1x8x32xf32, #tpu.memory_space<vmem>>, vector<1x8x32xf32>
    %1 = vector.shape_cast %0 : vector<1x8x32xf32> to vector<8x32xf32>
    %c0_2 = arith.constant 0 : index
    %c0_3 = arith.constant 0 : index
    %c0_4 = arith.constant 0 : index
    %2 = vector.load %arg2[%c0_2, %c0_3, %c0_4] : memref<1x1x8xf32, #tpu.memory_space<vmem>>, vector<1x1x8xf32>
    %3 = vector.shape_cast %2 : vector<1x1x8xf32> to vector<1x8xf32>
    %cst = arith.constant 0.000000e+00 : f32
    %4 = vector.broadcast %cst : f32 to vector<1x8xf32>
    %5 = arith.cmpf oeq, %3, %4 : vector<1x8xf32>
    %cst_5 = arith.constant -1.000000e+09 : f32
    %cst_6 = arith.constant 0.000000e+00 : f32
    %6 = vector.broadcast %cst_5 : f32 to vector<1x8xf32>
    %7 = vector.broadcast %cst_6 : f32 to vector<1x8xf32>
    %8 = arith.select %5, %6, %7 : vector<1x8xi1>, vector<1x8xf32>
    %c0_7 = arith.constant 0 : index
    %c0_8 = arith.constant 0 : index
    %9 = vector.load %arg11[%c0_7, %c0_8] : memref<1x32xf32, #tpu.memory_space<vmem>>, vector<1x32xf32>
    %c0_9 = arith.constant 0 : index
    %c0_10 = arith.constant 0 : index
    %10 = vector.load %arg12[%c0_9, %c0_10] : memref<1x32xf32, #tpu.memory_space<vmem>>, vector<1x32xf32>
    %cst_11 = arith.constant dense<0.000000e+00> : vector<8xf32>
    %11 = vector.multi_reduction <add>, %1, %cst_11 [1] : vector<8x32xf32> to vector<8xf32>
    %12 = vector.shape_cast %11 : vector<8xf32> to vector<8x1xf32>
    %cst_12 = arith.constant 3.200000e+01 : f32
    %13 = vector.broadcast %cst_12 : f32 to vector<8x1xf32>
    %14 = arith.divf %12, %13 : vector<8x1xf32>
    %15 = arith.mulf %1, %1 : vector<8x32xf32>
    %cst_13 = arith.constant dense<0.000000e+00> : vector<8xf32>
    %16 = vector.multi_reduction <add>, %15, %cst_13 [1] : vector<8x32xf32> to vector<8xf32>
    %17 = vector.shape_cast %16 : vector<8xf32> to vector<8x1xf32>
    %cst_14 = arith.constant 3.200000e+01 : f32
    %18 = vector.broadcast %cst_14 : f32 to vector<8x1xf32>
    %19 = arith.divf %17, %18 : vector<8x1xf32>
    %20 = arith.mulf %14, %14 : vector<8x1xf32>
    %21 = arith.subf %19, %20 : vector<8x1xf32>
    %22 = vector.broadcast %14 : vector<8x1xf32> to vector<8x32xf32>
    %23 = arith.subf %1, %22 : vector<8x32xf32>
    %cst_15 = arith.constant 9.99999974E-6 : f32
    %24 = vector.broadcast %cst_15 : f32 to vector<8x1xf32>
    %25 = arith.addf %21, %24 : vector<8x1xf32>
    %26 = math.rsqrt %25 : vector<8x1xf32>
    %27 = vector.broadcast %26 : vector<8x1xf32> to vector<8x32xf32>
    %28 = arith.mulf %23, %27 : vector<8x32xf32>
    %29 = vector.broadcast %9 : vector<1x32xf32> to vector<8x32xf32>
    %30 = arith.mulf %28, %29 : vector<8x32xf32>
    %31 = vector.broadcast %10 : vector<1x32xf32> to vector<8x32xf32>
    %32 = arith.addf %30, %31 : vector<8x32xf32>
    %33 = arith.truncf %32 : vector<8x32xf32> to vector<8x32xbf16>
    %c0_16 = arith.constant 0 : index
    %c0_17 = arith.constant 0 : index
    %34 = vector.load %arg3[%c0_16, %c0_17] : memref<32x32xbf16, #tpu.memory_space<vmem>>, vector<32x32xbf16>
    %cst_18 = arith.constant dense<0.000000e+00> : vector<8x32xf32>
    %35 = tpu.matmul %33, %34, %cst_18 {dimension_numbers = #tpu.dot_dimension_numbers<[1], [0], [0], [1], [0, 0, 1, 1], [], []>} : vector<8x32xbf16>, vector<32x32xbf16>, vector<8x32xf32> -> vector<8x32xf32>
    %c0_19 = arith.constant 0 : index
    %c0_20 = arith.constant 0 : index
    %36 = vector.load %arg4[%c0_19, %c0_20] : memref<1x32xf32, #tpu.memory_space<vmem>>, vector<1x32xf32>
    %37 = vector.broadcast %36 : vector<1x32xf32> to vector<8x32xf32>
    %38 = arith.addf %35, %37 : vector<8x32xf32>
    %cst_21 = arith.constant 0.353553385 : f32
    %39 = vector.broadcast %cst_21 : f32 to vector<8x32xf32>
    %40 = arith.mulf %38, %39 : vector<8x32xf32>
    %c0_22 = arith.constant 0 : index
    %c0_23 = arith.constant 0 : index
    %41 = vector.load %arg5[%c0_22, %c0_23] : memref<32x32xbf16, #tpu.memory_space<vmem>>, vector<32x32xbf16>
    %cst_24 = arith.constant dense<0.000000e+00> : vector<8x32xf32>
    %42 = tpu.matmul %33, %41, %cst_24 {dimension_numbers = #tpu.dot_dimension_numbers<[1], [0], [0], [1], [0, 0, 1, 1], [], []>} : vector<8x32xbf16>, vector<32x32xbf16>, vector<8x32xf32> -> vector<8x32xf32>
    %c0_25 = arith.constant 0 : index
    %c0_26 = arith.constant 0 : index
    %43 = vector.load %arg6[%c0_25, %c0_26] : memref<1x32xf32, #tpu.memory_space<vmem>>, vector<1x32xf32>
    %44 = vector.broadcast %43 : vector<1x32xf32> to vector<8x32xf32>
    %45 = arith.addf %42, %44 : vector<8x32xf32>
    %c0_27 = arith.constant 0 : index
    %c0_28 = arith.constant 0 : index
    %46 = vector.load %arg7[%c0_27, %c0_28] : memref<32x32xbf16, #tpu.memory_space<vmem>>, vector<32x32xbf16>
    %cst_29 = arith.constant dense<0.000000e+00> : vector<8x32xf32>
    %47 = tpu.matmul %33, %46, %cst_29 {dimension_numbers = #tpu.dot_dimension_numbers<[1], [0], [0], [1], [0, 0, 1, 1], [], []>} : vector<8x32xbf16>, vector<32x32xbf16>, vector<8x32xf32> -> vector<8x32xf32>
    %c0_30 = arith.constant 0 : index
    %c0_31 = arith.constant 0 : index
    %48 = vector.load %arg8[%c0_30, %c0_31] : memref<1x32xf32, #tpu.memory_space<vmem>>, vector<1x32xf32>
    %49 = vector.broadcast %48 : vector<1x32xf32> to vector<8x32xf32>
    %50 = arith.addf %47, %49 : vector<8x32xf32>
    %51 = arith.truncf %40 : vector<8x32xf32> to vector<8x32xbf16>
    %52 = arith.truncf %45 : vector<8x32xf32> to vector<8x32xbf16>
    %53 = arith.truncf %50 : vector<8x32xf32> to vector<8x32xbf16>
    %cst_32 = arith.constant 0.000000e+00 : f32
    %54 = vector.broadcast %cst_32 : f32 to vector<8x32xf32>
    %55 = vector.extract_strided_slice %51 {offsets = [0, 0], sizes = [8, 8], strides = [1, 1]} : vector<8x32xbf16> to vector<8x8xbf16>
    %56 = vector.extract_strided_slice %52 {offsets = [0, 0], sizes = [8, 8], strides = [1, 1]} : vector<8x32xbf16> to vector<8x8xbf16>
    %57 = vector.extract_strided_slice %53 {offsets = [0, 0], sizes = [8, 8], strides = [1, 1]} : vector<8x32xbf16> to vector<8x8xbf16>
    %cst_33 = arith.constant dense<0.000000e+00> : vector<8x8xf32>
    %58 = tpu.matmul %55, %56, %cst_33 {dimension_numbers = #tpu.dot_dimension_numbers<[1], [1], [0], [0], [0, 0, 1, 0], [], []>} : vector<8x8xbf16>, vector<8x8xbf16>, vector<8x8xf32> -> vector<8x8xf32>
    %59 = vector.broadcast %8 : vector<1x8xf32> to vector<8x8xf32>
    %60 = arith.addf %58, %59 : vector<8x8xf32>
    %cst_34 = arith.constant dense<0xFF800000> : vector<8xf32>
    %61 = vector.multi_reduction <maximumf>, %60, %cst_34 [1] : vector<8x8xf32> to vector<8xf32>
    %62 = vector.shape_cast %61 : vector<8xf32> to vector<8x1xf32>
    %63 = vector.broadcast %62 : vector<8x1xf32> to vector<8x8xf32>
    %64 = arith.subf %60, %63 : vector<8x8xf32>
    %65 = math.exp %64 : vector<8x8xf32>
    %cst_35 = arith.constant dense<0.000000e+00> : vector<8xf32>
    %66 = vector.multi_reduction <add>, %65, %cst_35 [1] : vector<8x8xf32> to vector<8xf32>
    %67 = vector.shape_cast %66 : vector<8xf32> to vector<8x1xf32>
    %68 = tpu.reciprocal %67 {approx = true} : vector<8x1xf32> -> vector<8x1xf32>
    %69 = vector.broadcast %68 : vector<8x1xf32> to vector<8x8xf32>
    %70 = arith.mulf %65, %69 : vector<8x8xf32>
    %71 = arith.truncf %70 : vector<8x8xf32> to vector<8x8xbf16>
    %cst_36 = arith.constant dense<0.000000e+00> : vector<8x8xf32>
    %72 = tpu.matmul %71, %57, %cst_36 {dimension_numbers = #tpu.dot_dimension_numbers<[1], [0], [0], [1], [0, 0, 1, 1], [], []>} : vector<8x8xbf16>, vector<8x8xbf16>, vector<8x8xf32> -> vector<8x8xf32>
    %73 = arith.truncf %72 : vector<8x8xf32> to vector<8x8xbf16>
    %c0_37 = arith.constant 0 : index
    %c0_38 = arith.constant 0 : index
    %c0_39 = arith.constant 0 : index
    %74 = vector.load %arg9[%c0_37, %c0_38, %c0_39] : memref<4x8x32xbf16, #tpu.memory_space<vmem>>, vector<1x8x32xbf16>
    %75 = vector.shape_cast %74 : vector<1x8x32xbf16> to vector<8x32xbf16>
    %cst_40 = arith.constant dense<0.000000e+00> : vector<8x32xf32>
    %76 = tpu.matmul %73, %75, %cst_40 {dimension_numbers = #tpu.dot_dimension_numbers<[1], [0], [0], [1], [0, 0, 1, 1], [], []>} : vector<8x8xbf16>, vector<8x32xbf16>, vector<8x32xf32> -> vector<8x32xf32>
    %77 = arith.addf %54, %76 : vector<8x32xf32>
    %78 = vector.extract_strided_slice %51 {offsets = [0, 8], sizes = [8, 8], strides = [1, 1]} : vector<8x32xbf16> to vector<8x8xbf16>
    %79 = vector.extract_strided_slice %52 {offsets = [0, 8], sizes = [8, 8], strides = [1, 1]} : vector<8x32xbf16> to vector<8x8xbf16>
    %80 = vector.extract_strided_slice %53 {offsets = [0, 8], sizes = [8, 8], strides = [1, 1]} : vector<8x32xbf16> to vector<8x8xbf16>
    %cst_41 = arith.constant dense<0.000000e+00> : vector<8x8xf32>
    %81 = tpu.matmul %78, %79, %cst_41 {dimension_numbers = #tpu.dot_dimension_numbers<[1], [1], [0], [0], [0, 0, 1, 0], [], []>} : vector<8x8xbf16>, vector<8x8xbf16>, vector<8x8xf32> -> vector<8x8xf32>
    %82 = vector.broadcast %8 : vector<1x8xf32> to vector<8x8xf32>
    %83 = arith.addf %81, %82 : vector<8x8xf32>
    %cst_42 = arith.constant dense<0xFF800000> : vector<8xf32>
    %84 = vector.multi_reduction <maximumf>, %83, %cst_42 [1] : vector<8x8xf32> to vector<8xf32>
    %85 = vector.shape_cast %84 : vector<8xf32> to vector<8x1xf32>
    %86 = vector.broadcast %85 : vector<8x1xf32> to vector<8x8xf32>
    %87 = arith.subf %83, %86 : vector<8x8xf32>
    %88 = math.exp %87 : vector<8x8xf32>
    %cst_43 = arith.constant dense<0.000000e+00> : vector<8xf32>
    %89 = vector.multi_reduction <add>, %88, %cst_43 [1] : vector<8x8xf32> to vector<8xf32>
    %90 = vector.shape_cast %89 : vector<8xf32> to vector<8x1xf32>
    %91 = tpu.reciprocal %90 {approx = true} : vector<8x1xf32> -> vector<8x1xf32>
    %92 = vector.broadcast %91 : vector<8x1xf32> to vector<8x8xf32>
    %93 = arith.mulf %88, %92 : vector<8x8xf32>
    %94 = arith.truncf %93 : vector<8x8xf32> to vector<8x8xbf16>
    %cst_44 = arith.constant dense<0.000000e+00> : vector<8x8xf32>
    %95 = tpu.matmul %94, %80, %cst_44 {dimension_numbers = #tpu.dot_dimension_numbers<[1], [0], [0], [1], [0, 0, 1, 1], [], []>} : vector<8x8xbf16>, vector<8x8xbf16>, vector<8x8xf32> -> vector<8x8xf32>
    %96 = arith.truncf %95 : vector<8x8xf32> to vector<8x8xbf16>
    %c1 = arith.constant 1 : index
    %c0_45 = arith.constant 0 : index
    %c0_46 = arith.constant 0 : index
    %97 = vector.load %arg9[%c1, %c0_45, %c0_46] : memref<4x8x32xbf16, #tpu.memory_space<vmem>>, vector<1x8x32xbf16>
    %98 = vector.shape_cast %97 : vector<1x8x32xbf16> to vector<8x32xbf16>
    %cst_47 = arith.constant dense<0.000000e+00> : vector<8x32xf32>
    %99 = tpu.matmul %96, %98, %cst_47 {dimension_numbers = #tpu.dot_dimension_numbers<[1], [0], [0], [1], [0, 0, 1, 1], [], []>} : vector<8x8xbf16>, vector<8x32xbf16>, vector<8x32xf32> -> vector<8x32xf32>
    %100 = arith.addf %77, %99 : vector<8x32xf32>
    %101 = vector.extract_strided_slice %51 {offsets = [0, 16], sizes = [8, 8], strides = [1, 1]} : vector<8x32xbf16> to vector<8x8xbf16>
    %102 = vector.extract_strided_slice %52 {offsets = [0, 16], sizes = [8, 8], strides = [1, 1]} : vector<8x32xbf16> to vector<8x8xbf16>
    %103 = vector.extract_strided_slice %53 {offsets = [0, 16], sizes = [8, 8], strides = [1, 1]} : vector<8x32xbf16> to vector<8x8xbf16>
    %cst_48 = arith.constant dense<0.000000e+00> : vector<8x8xf32>
    %104 = tpu.matmul %101, %102, %cst_48 {dimension_numbers = #tpu.dot_dimension_numbers<[1], [1], [0], [0], [0, 0, 1, 0], [], []>} : vector<8x8xbf16>, vector<8x8xbf16>, vector<8x8xf32> -> vector<8x8xf32>
    %105 = vector.broadcast %8 : vector<1x8xf32> to vector<8x8xf32>
    %106 = arith.addf %104, %105 : vector<8x8xf32>
    %cst_49 = arith.constant dense<0xFF800000> : vector<8xf32>
    %107 = vector.multi_reduction <maximumf>, %106, %cst_49 [1] : vector<8x8xf32> to vector<8xf32>
    %108 = vector.shape_cast %107 : vector<8xf32> to vector<8x1xf32>
    %109 = vector.broadcast %108 : vector<8x1xf32> to vector<8x8xf32>
    %110 = arith.subf %106, %109 : vector<8x8xf32>
    %111 = math.exp %110 : vector<8x8xf32>
    %cst_50 = arith.constant dense<0.000000e+00> : vector<8xf32>
    %112 = vector.multi_reduction <add>, %111, %cst_50 [1] : vector<8x8xf32> to vector<8xf32>
    %113 = vector.shape_cast %112 : vector<8xf32> to vector<8x1xf32>
    %114 = tpu.reciprocal %113 {approx = true} : vector<8x1xf32> -> vector<8x1xf32>
    %115 = vector.broadcast %114 : vector<8x1xf32> to vector<8x8xf32>
    %116 = arith.mulf %111, %115 : vector<8x8xf32>
    %117 = arith.truncf %116 : vector<8x8xf32> to vector<8x8xbf16>
    %cst_51 = arith.constant dense<0.000000e+00> : vector<8x8xf32>
    %118 = tpu.matmul %117, %103, %cst_51 {dimension_numbers = #tpu.dot_dimension_numbers<[1], [0], [0], [1], [0, 0, 1, 1], [], []>} : vector<8x8xbf16>, vector<8x8xbf16>, vector<8x8xf32> -> vector<8x8xf32>
    %119 = arith.truncf %118 : vector<8x8xf32> to vector<8x8xbf16>
    %c2 = arith.constant 2 : index
    %c0_52 = arith.constant 0 : index
    %c0_53 = arith.constant 0 : index
    %120 = vector.load %arg9[%c2, %c0_52, %c0_53] : memref<4x8x32xbf16, #tpu.memory_space<vmem>>, vector<1x8x32xbf16>
    %121 = vector.shape_cast %120 : vector<1x8x32xbf16> to vector<8x32xbf16>
    %cst_54 = arith.constant dense<0.000000e+00> : vector<8x32xf32>
    %122 = tpu.matmul %119, %121, %cst_54 {dimension_numbers = #tpu.dot_dimension_numbers<[1], [0], [0], [1], [0, 0, 1, 1], [], []>} : vector<8x8xbf16>, vector<8x32xbf16>, vector<8x32xf32> -> vector<8x32xf32>
    %123 = arith.addf %100, %122 : vector<8x32xf32>
    %124 = vector.extract_strided_slice %51 {offsets = [0, 24], sizes = [8, 8], strides = [1, 1]} : vector<8x32xbf16> to vector<8x8xbf16>
    %125 = vector.extract_strided_slice %52 {offsets = [0, 24], sizes = [8, 8], strides = [1, 1]} : vector<8x32xbf16> to vector<8x8xbf16>
    %126 = vector.extract_strided_slice %53 {offsets = [0, 24], sizes = [8, 8], strides = [1, 1]} : vector<8x32xbf16> to vector<8x8xbf16>
    %cst_55 = arith.constant dense<0.000000e+00> : vector<8x8xf32>
    %127 = tpu.matmul %124, %125, %cst_55 {dimension_numbers = #tpu.dot_dimension_numbers<[1], [1], [0], [0], [0, 0, 1, 0], [], []>} : vector<8x8xbf16>, vector<8x8xbf16>, vector<8x8xf32> -> vector<8x8xf32>
    %128 = vector.broadcast %8 : vector<1x8xf32> to vector<8x8xf32>
    %129 = arith.addf %127, %128 : vector<8x8xf32>
    %cst_56 = arith.constant dense<0xFF800000> : vector<8xf32>
    %130 = vector.multi_reduction <maximumf>, %129, %cst_56 [1] : vector<8x8xf32> to vector<8xf32>
    %131 = vector.shape_cast %130 : vector<8xf32> to vector<8x1xf32>
    %132 = vector.broadcast %131 : vector<8x1xf32> to vector<8x8xf32>
    %133 = arith.subf %129, %132 : vector<8x8xf32>
    %134 = math.exp %133 : vector<8x8xf32>
    %cst_57 = arith.constant dense<0.000000e+00> : vector<8xf32>
    %135 = vector.multi_reduction <add>, %134, %cst_57 [1] : vector<8x8xf32> to vector<8xf32>
    %136 = vector.shape_cast %135 : vector<8xf32> to vector<8x1xf32>
    %137 = tpu.reciprocal %136 {approx = true} : vector<8x1xf32> -> vector<8x1xf32>
    %138 = vector.broadcast %137 : vector<8x1xf32> to vector<8x8xf32>
    %139 = arith.mulf %134, %138 : vector<8x8xf32>
    %140 = arith.truncf %139 : vector<8x8xf32> to vector<8x8xbf16>
    %cst_58 = arith.constant dense<0.000000e+00> : vector<8x8xf32>
    %141 = tpu.matmul %140, %126, %cst_58 {dimension_numbers = #tpu.dot_dimension_numbers<[1], [0], [0], [1], [0, 0, 1, 1], [], []>} : vector<8x8xbf16>, vector<8x8xbf16>, vector<8x8xf32> -> vector<8x8xf32>
    %142 = arith.truncf %141 : vector<8x8xf32> to vector<8x8xbf16>
    %c3 = arith.constant 3 : index
    %c0_59 = arith.constant 0 : index
    %c0_60 = arith.constant 0 : index
    %143 = vector.load %arg9[%c3, %c0_59, %c0_60] : memref<4x8x32xbf16, #tpu.memory_space<vmem>>, vector<1x8x32xbf16>
    %144 = vector.shape_cast %143 : vector<1x8x32xbf16> to vector<8x32xbf16>
    %cst_61 = arith.constant dense<0.000000e+00> : vector<8x32xf32>
    %145 = tpu.matmul %142, %144, %cst_61 {dimension_numbers = #tpu.dot_dimension_numbers<[1], [0], [0], [1], [0, 0, 1, 1], [], []>} : vector<8x8xbf16>, vector<8x32xbf16>, vector<8x32xf32> -> vector<8x32xf32>
    %146 = arith.addf %123, %145 : vector<8x32xf32>
    %c0_62 = arith.constant 0 : index
    %c0_63 = arith.constant 0 : index
    %147 = vector.load %arg10[%c0_62, %c0_63] : memref<1x32xf32, #tpu.memory_space<vmem>>, vector<1x32xf32>
    %148 = vector.broadcast %147 : vector<1x32xf32> to vector<8x32xf32>
    %149 = arith.addf %146, %148 : vector<8x32xf32>
    %150 = arith.addf %1, %149 : vector<8x32xf32>
    %c0_64 = arith.constant 0 : index
    %c0_65 = arith.constant 0 : index
    %151 = vector.load %arg13[%c0_64, %c0_65] : memref<1x32xf32, #tpu.memory_space<vmem>>, vector<1x32xf32>
    %c0_66 = arith.constant 0 : index
    %c0_67 = arith.constant 0 : index
    %152 = vector.load %arg14[%c0_66, %c0_67] : memref<1x32xf32, #tpu.memory_space<vmem>>, vector<1x32xf32>
    %cst_68 = arith.constant dense<0.000000e+00> : vector<8xf32>
    %153 = vector.multi_reduction <add>, %150, %cst_68 [1] : vector<8x32xf32> to vector<8xf32>
    %154 = vector.shape_cast %153 : vector<8xf32> to vector<8x1xf32>
    %cst_69 = arith.constant 3.200000e+01 : f32
    %155 = vector.broadcast %cst_69 : f32 to vector<8x1xf32>
    %156 = arith.divf %154, %155 : vector<8x1xf32>
    %157 = arith.mulf %150, %150 : vector<8x32xf32>
    %cst_70 = arith.constant dense<0.000000e+00> : vector<8xf32>
    %158 = vector.multi_reduction <add>, %157, %cst_70 [1] : vector<8x32xf32> to vector<8xf32>
    %159 = vector.shape_cast %158 : vector<8xf32> to vector<8x1xf32>
    %cst_71 = arith.constant 3.200000e+01 : f32
    %160 = vector.broadcast %cst_71 : f32 to vector<8x1xf32>
    %161 = arith.divf %159, %160 : vector<8x1xf32>
    %162 = arith.mulf %156, %156 : vector<8x1xf32>
    %163 = arith.subf %161, %162 : vector<8x1xf32>
    %164 = vector.broadcast %156 : vector<8x1xf32> to vector<8x32xf32>
    %165 = arith.subf %150, %164 : vector<8x32xf32>
    %cst_72 = arith.constant 9.99999974E-6 : f32
    %166 = vector.broadcast %cst_72 : f32 to vector<8x1xf32>
    %167 = arith.addf %163, %166 : vector<8x1xf32>
    %168 = math.rsqrt %167 : vector<8x1xf32>
    %169 = vector.broadcast %168 : vector<8x1xf32> to vector<8x32xf32>
    %170 = arith.mulf %165, %169 : vector<8x32xf32>
    %171 = vector.broadcast %151 : vector<1x32xf32> to vector<8x32xf32>
    %172 = arith.mulf %170, %171 : vector<8x32xf32>
    %173 = vector.broadcast %152 : vector<1x32xf32> to vector<8x32xf32>
    %174 = arith.addf %172, %173 : vector<8x32xf32>
    %175 = arith.truncf %174 : vector<8x32xf32> to vector<8x32xbf16>
    %c0_73 = arith.constant 0 : index
    %c0_74 = arith.constant 0 : index
    %176 = vector.load %arg15[%c0_73, %c0_74] : memref<32x64xbf16, #tpu.memory_space<vmem>>, vector<32x64xbf16>
    %cst_75 = arith.constant dense<0.000000e+00> : vector<8x64xf32>
    %177 = tpu.matmul %175, %176, %cst_75 {dimension_numbers = #tpu.dot_dimension_numbers<[1], [0], [0], [1], [0, 0, 1, 1], [], []>} : vector<8x32xbf16>, vector<32x64xbf16>, vector<8x64xf32> -> vector<8x64xf32>
    %c0_76 = arith.constant 0 : index
    %c0_77 = arith.constant 0 : index
    %178 = vector.load %arg16[%c0_76, %c0_77] : memref<1x64xf32, #tpu.memory_space<vmem>>, vector<1x64xf32>
    %179 = vector.broadcast %178 : vector<1x64xf32> to vector<8x64xf32>
    %180 = arith.addf %177, %179 : vector<8x64xf32>
    %cst_78 = arith.constant 0.000000e+00 : f32
    %181 = vector.broadcast %cst_78 : f32 to vector<8x64xf32>
    %182 = arith.maximumf %180, %181 : vector<8x64xf32>
    %183 = arith.truncf %182 : vector<8x64xf32> to vector<8x64xbf16>
    %c0_79 = arith.constant 0 : index
    %c0_80 = arith.constant 0 : index
    %184 = vector.load %arg17[%c0_79, %c0_80] : memref<64x32xbf16, #tpu.memory_space<vmem>>, vector<64x32xbf16>
    %cst_81 = arith.constant dense<0.000000e+00> : vector<8x32xf32>
    %185 = tpu.matmul %183, %184, %cst_81 {dimension_numbers = #tpu.dot_dimension_numbers<[1], [0], [0], [1], [0, 0, 1, 1], [], []>} : vector<8x64xbf16>, vector<64x32xbf16>, vector<8x32xf32> -> vector<8x32xf32>
    %c0_82 = arith.constant 0 : index
    %c0_83 = arith.constant 0 : index
    %186 = vector.load %arg18[%c0_82, %c0_83] : memref<1x32xf32, #tpu.memory_space<vmem>>, vector<1x32xf32>
    %187 = vector.broadcast %186 : vector<1x32xf32> to vector<8x32xf32>
    %188 = arith.addf %185, %187 : vector<8x32xf32>
    %189 = arith.addf %150, %188 : vector<8x32xf32>
    %c0_84 = arith.constant 0 : index
    %c0_85 = arith.constant 0 : index
    %c0_86 = arith.constant 0 : index
    %190 = vector.load %arg19[%c0_84, %c0_85, %c0_86] : memref<1x8x32xf32, #tpu.memory_space<vmem>>, vector<1x8x32xf32>
    %191 = vector.shape_cast %190 : vector<1x8x32xf32> to vector<8x32xf32>
    %192 = vector.shape_cast %189 : vector<8x32xf32> to vector<1x8x32xf32>
    tpu.vector_store %arg19[%c0_84, %c0_85, %c0_86], %192 {strides = array<i32>} : memref<1x8x32xf32, #tpu.memory_space<vmem>>, vector<1x8x32xf32>,
    return
  }
  func.func @transform_0(%arg0: i32) -> (i32, i32, i32) {
    %c0_i32 = arith.constant 0 : i32
    %c0_i32_0 = arith.constant 0 : i32
    %c0_i32_1 = arith.constant 0 : i32
    return %arg0, %c0_i32, %c0_i32_0 : i32, i32, i32
  }
  func.func @transform_1(%arg0: i32) -> (i32, i32, i32) {
    %c0_i32 = arith.constant 0 : i32
    %c0_i32_0 = arith.constant 0 : i32
    %c0_i32_1 = arith.constant 0 : i32
    return %arg0, %c0_i32, %c0_i32_0 : i32, i32, i32
  }
  func.func @transform_2(%arg0: i32) -> (i32, i32) {
    %c0_i32 = arith.constant 0 : i32
    %c0_i32_0 = arith.constant 0 : i32
    %c0_i32_1 = arith.constant 0 : i32
    return %c0_i32, %c0_i32_0 : i32, i32
  }
  func.func @transform_3(%arg0: i32) -> (i32, i32) {
    %c0_i32 = arith.constant 0 : i32
    %c0_i32_0 = arith.constant 0 : i32
    %c0_i32_1 = arith.constant 0 : i32
    return %c0_i32, %c0_i32_0 : i32, i32
  }
  func.func @transform_4(%arg0: i32) -> (i32, i32) {
    %c0_i32 = arith.constant 0 : i32
    %c0_i32_0 = arith.constant 0 : i32
    %c0_i32_1 = arith.constant 0 : i32
    return %c0_i32, %c0_i32_0 : i32, i32
  }
  func.func @transform_5(%arg0: i32) -> (i32, i32) {
    %c0_i32 = arith.constant 0 : i32
    %c0_i32_0 = arith.constant 0 : i32
    %c0_i32_1 = arith.constant 0 : i32
    return %c0_i32, %c0_i32_0 : i32, i32
  }
  func.func @transform_6(%arg0: i32) -> (i32, i32) {
    %c0_i32 = arith.constant 0 : i32
    %c0_i32_0 = arith.constant 0 : i32
    %c0_i32_1 = arith.constant 0 : i32
    return %c0_i32, %c0_i32_0 : i32, i32
  }
  func.func @transform_7(%arg0: i32) -> (i32, i32) {
    %c0_i32 = arith.constant 0 : i32
    %c0_i32_0 = arith.constant 0 : i32
    %c0_i32_1 = arith.constant 0 : i32
    return %c0_i32, %c0_i32_0 : i32, i32
  }
  func.func @transform_8(%arg0: i32) -> (i32, i32, i32) {
    %c0_i32 = arith.constant 0 : i32
    %c0_i32_0 = arith.constant 0 : i32
    %c0_i32_1 = arith.constant 0 : i32
    %c0_i32_2 = arith.constant 0 : i32
    return %c0_i32, %c0_i32_0, %c0_i32_1 : i32, i32, i32
  }
  func.func @transform_9(%arg0: i32) -> (i32, i32) {
    %c0_i32 = arith.constant 0 : i32
    %c0_i32_0 = arith.constant 0 : i32
    %c0_i32_1 = arith.constant 0 : i32
    return %c0_i32, %c0_i32_0 : i32, i32
  }
  func.func @transform_10(%arg0: i32) -> (i32, i32) {
    %c0_i32 = arith.constant 0 : i32
    %c0_i32_0 = arith.constant 0 : i32
    %c0_i32_1 = arith.constant 0 : i32
    return %c0_i32, %c0_i32_0 : i32, i32
  }
  func.func @transform_11(%arg0: i32) -> (i32, i32) {
    %c0_i32 = arith.constant 0 : i32
    %c0_i32_0 = arith.constant 0 : i32
    %c0_i32_1 = arith.constant 0 : i32
    return %c0_i32, %c0_i32_0 : i32, i32
  }
  func.func @transform_12(%arg0: i32) -> (i32, i32) {
    %c0_i32 = arith.constant 0 : i32
    %c0_i32_0 = arith.constant 0 : i32
    %c0_i32_1 = arith.constant 0 : i32
    return %c0_i32, %c0_i32_0 : i32, i32
  }
  func.func @transform_13(%arg0: i32) -> (i32, i32) {
    %c0_i32 = arith.constant 0 : i32
    %c0_i32_0 = arith.constant 0 : i32
    %c0_i32_1 = arith.constant 0 : i32
    return %c0_i32, %c0_i32_0 : i32, i32
  }
  func.func @transform_14(%arg0: i32) -> (i32, i32) {
    %c0_i32 = arith.constant 0 : i32
    %c0_i32_0 = arith.constant 0 : i32
    %c0_i32_1 = arith.constant 0 : i32
    return %c0_i32, %c0_i32_0 : i32, i32
  }
  func.func @transform_15(%arg0: i32) -> (i32, i32) {
    %c0_i32 = arith.constant 0 : i32
    %c0_i32_0 = arith.constant 0 : i32
    %c0_i32_1 = arith.constant 0 : i32
    return %c0_i32, %c0_i32_0 : i32, i32
  }
  func.func @transform_16(%arg0: i32) -> (i32, i32) {
    %c0_i32 = arith.constant 0 : i32
    %c0_i32_0 = arith.constant 0 : i32
    %c0_i32_1 = arith.constant 0 : i32
    return %c0_i32, %c0_i32_0 : i32, i32
  }
  func.func @transform_17(%arg0: i32) -> (i32, i32) {
    %c0_i32 = arith.constant 0 : i32
    %c0_i32_0 = arith.constant 0 : i32
    %c0_i32_1 = arith.constant 0 : i32
    return %c0_i32, %c0_i32_0 : i32, i32
  }
  func.func @transform_18(%arg0: i32) -> (i32, i32, i32) {
    %c0_i32 = arith.constant 0 : i32
    %c0_i32_0 = arith.constant 0 : i32
    %c0_i32_1 = arith.constant 0 : i32
    return %arg0, %c0_i32, %c0_i32_0 : i32, i32, i32
  }
}

</mosaic_0001>

<bundles_post_ra>
// kernel: tpu_custom_call.1
= control target key start
LH: loop header
LB: loop body
LE: loop exit
PB: predicated region body
PF: predicated region fallthrough
CT: control target
= control target key end

     0   :  { %s3077_s0 = inlined_call_operand.vmem [shape: f32[2,8,32], index: 0, kind: input, shape index: {}]   ;;  %s3078_s1 = inlined_call_operand.hbm [shape: f32[2,1,8], index: 1, kind: input, shape index: {}]   ;;  %s3079_s2 = inlined_call_operand.vmem [shape: bf16[32,32], index: 2, kind: input, shape index: {}]   ;;  %s3080_s3 = inlined_call_operand.hbm [shape: f32[1,32], index: 3, kind: input, shape index: {}]   ;;  %s3081_s4 = inlined_call_operand.vmem [shape: bf16[32,32], index: 4, kind: input, shape index: {}]   ;;  %s3082_s5 = inlined_call_operand.hbm [shape: f32[1,32], index: 5, kind: input, shape index: {}]   ;;  %s3083_s6 = inlined_call_operand.hbm [shape: bf16[32,32], index: 6, kind: input, shape index: {}]   ;;  %s3084_s7 = inlined_call_operand.hbm [shape: f32[1,32], index: 7, kind: input, shape index: {}]   ;;  %s3085_s8 = inlined_call_operand.hbm [shape: bf16[4,8,32], index: 8, kind: input, shape index: {}]   ;;  %s3086_s9 = inlined_call_operand.hbm [shape: f32[1,32], index: 9, kind: input, shape index: {}]   ;;  %s3087_s10 = inlined_call_operand.vmem [shape: f32[1,32], index: 10, kind: input, shape index: {}]   ;;  %s3088_s11 = inlined_call_operand.vmem [shape: f32[1,32], index: 11, kind: input, shape index: {}]   ;;  %s3089_s12 = inlined_call_operand.vmem [shape: f32[1,32], index: 12, kind: input, shape index: {}]   ;;  %s3090_s13 = inlined_call_operand.vmem [shape: f32[1,32], index: 13, kind: input, shape index: {}]   ;;  %s3091_s14 = inlined_call_operand.vmem [shape: bf16[32,64], index: 14, kind: input, shape index: {}]   ;;  %s3092_s15 = inlined_call_operand.vmem [shape: f32[1,64], index: 15, kind: input, shape index: {}]   ;;  %s3093_s16 = inlined_call_operand.vmem [shape: bf16[64,32], index: 16, kind: input, shape index: {}]   ;;  %s3094_s17 = inlined_call_operand.vmem [shape: f32[1,32], index: 17, kind: input, shape index: {}]   ;;  %s3095_s18 = inlined_call_operand.hbm [shape: f32[2,8,32], index: 18, kind: output, shape index: {}]  }
   0x1   :  { %3106 = sst [smem:[#allocation23_spill]] %s3077_s0 }
   0x2   :  { %3107 = sst [smem:[#allocation24_spill]] %s3078_s1 }
   0x3   :  { %3108 = sst [smem:[#allocation25_spill]] %s3079_s2 }
   0x4   :  { %3109 = sst [smem:[#allocation26_spill]] %s3080_s3 }
   0x5   :  { %3110 = sst [smem:[#allocation27_spill]] %s3082_s5 }
   0x6   :  { %3111 = sst [smem:[#allocation28_spill]] %s3083_s6 }
   0x7   :  { %3112 = sst [smem:[#allocation29_spill]] %s3084_s7 }
   0x8   :  { %3113 = sst [smem:[#allocation30_spill]] %s3085_s8 }
   0x9   :  { %3114 = sst [smem:[#allocation31_spill]] %s3086_s9 }
   0xa   :  { %3115 = sst [smem:[#allocation32_spill]] %s3094_s17 }
   0xb   :  { %3116 = sst [smem:[#allocation33_spill]] %s3095_s18 }
   0xc   :  { %23 = vsyncpa [#allocation3], 0 }
   0xd   :  { %25 = vsyncpa [#allocation3 + $0x1], 0 }
   0xe   :  { %26 = vsyncpa [#allocation6], 0 }
   0xf   :  { %27 = vsyncpa [#allocation9], 0 }
  0x10   :  { %28 = vsyncpa [#allocation12], 0 }
  0x11   :  { %29 = vsyncpa [#allocation4], 0 }
  0x12   :  { %31 = vsyncpa [#allocation4 + $0x1], 0  ;;  %s2642_s27 = smov 0   ;;  %s2644_s28 = smov 0  }
  0x13   :  { %s2646_s29 = smov 0   ;;  %s2648_s30 = smov 0  }
  0x14 LB: > { %3117 = sst [smem:[#allocation20_spill]] %s2526_s29  ;;  %s2532_s0 = smov [#allocation5]   ;;  %s2530_s30 = sphi %s2648_s30, %s3151_s30   ;;  %s2526_s29 = sphi %s2646_s29, %s3153_s29   ;;  %s2522_s28 = sphi %s2644_s28, %s3155_s28   ;;  %s2518_s27 = sphi %s2642_s27, %s3154_s27  }
  0x15   : > { %s472_s19 = sshll.u32 %s2532_s0, 4  ;;  %s2663_s1 = sadd.s32 4294967295, %s2530_s30   ;;  %s473_s19 = int_to_ptr.vmem [resolvable:$true] %s472_s19 }
  0x16   : > { %p1906_p0 = scmp.ge.s32.totalorder %s2530_s30, 1  ;;  %p3099_p1 = scmp.eq.s32.totalorder %s2663_s1, 0 }
  0x17   : > { %p456_p2 = scmp.lt.s32.totalorder %s2530_s30, 3  ;;  %s2533_s21 = smov [#allocation8]  }
  0x18   : > { %s496_s22 = sshll.u32 %s2533_s21, 4  ;;  %s2534_s23 = smov [#allocation11]   ;;  %s2675_s22 = int_to_ptr.vmem [resolvable:$true] %s496_s22 }
  0x19   : > { %p2668_p3 = pnand %p1906_p0, %p456_p2  ;;  %s520_s24 = sshll.u32 %s2534_s23, 4  ;;  %s2683_s24 = int_to_ptr.vmem [resolvable:$true] %s520_s24 }
  0x1a   : > { %s2281_s26 = scalar_lea.vmem %s473_s19, 16  ;;  %s2288_s0 = scalar_lea.vmem %s473_s19, 32 }
  0x1b   : > { %s3118_s20 = scalar_select %p2668_p3, 1, 0 }
  0x1c   : > { %p2152_p5 = pneg %p2668_p3  ;;  %p2282_p8 = scmp.ne.s32.totalorder %s473_s19, %s2281_s26 }
  0x1d   : > { %p2289_p11 = scmp.lt.s32.totalorder %s473_s19, %s473_s19  ;;  %p2290_p12 = scmp.lt.s32.totalorder %s2288_s0, %s2281_s26 }
  0x1e   : > { %p2679_p6 = pnand %p2152_p5, %p3099_p1 }
  0x1f   : > { %p2291_p13 = por %p2290_p12, %p2289_p11 }
  0x20   : > { %p2687_p7 = pneg %p2679_p6 }
  0x22   : > { %p2284_p9 = pnand %p2282_p8, %p2687_p7 }
  0x24   : > { %p2285_p10 = pneg %p2284_p9 }
  0x26   : > { %p2292_p0 = pnand %p2291_p13, %p2285_p10 }
  0x28   : > { %2295 = shalt.err (!%p2292_p0)
}
  0x29   : > { %s3121_s3 = sld [smem:[#allocation26_spill]]  ;;  %s2307_s18 = scalar_lea.vmem %s2675_s22, 256 }
  0x2a   : > { %p2308_p2 = scmp.ne.s32.totalorder %s2675_s22, %s2307_s18  ;;  %p2315_p9 = scmp.lt.s32.totalorder %s2675_s22, %s2675_s22 }
  0x2b   : > { %p2316_p11 = scmp.lt.s32.totalorder %s2307_s18, %s2307_s18 }
  0x2c   : > { %p2310_p5 = pnand %p2308_p2, %p2687_p7 }
  0x2d   : > { %p2317_p10 = por %p2316_p11, %p2315_p9 }
  0x2e   : > { %p2311_p8 = pneg %p2310_p5 }
  0x2f   : > { %2155 = dma.hbm_to_vmem [thread:$0]  (!%p2679_p6), %s3121_s3, 16, %s473_s19, [#allocation6]  }
  0x30   : > { %p2318_p12 = pnand %p2317_p10, %p2311_p8 }
  0x32   : > { %2321 = shalt.err (!%p2318_p12)
}
  0x33   : > { %s2535_s26 = smov 64   ;;  %s2536_s0 = smov 4  }
  0x34   : > { %s3122_s6 = sld [smem:[#allocation28_spill]]  ;;  %s2333_s23 = scalar_lea.vmem %s2683_s24, 256 }
  0x35   : > { %p2334_p13 = scmp.ne.s32.totalorder %s2683_s24, %s2333_s23  ;;  %p2341_p5 = scmp.lt.s32.totalorder %s2683_s24, %s2683_s24 }
  0x36   : > { %p2342_p8 = scmp.lt.s32.totalorder %s2333_s23, %s2333_s23 }
  0x37   : > { %p2336_p0 = pnand %p2334_p13, %p2687_p7 }
  0x38   : > { %p2343_p9 = por %p2342_p8, %p2341_p5 }
  0x39   : > { %p2337_p2 = pneg %p2336_p0 }
  0x3a   : > { %2161 = dma.hbm_to_vmem [thread:$0]  (!%p2679_p6), %s3122_s6, 256, %s2675_s22, [#allocation9], %s2535_s26, %s2535_s26, %s2536_s0  }
  0x3b   : > { %p2344_p11 = pnand %p2343_p9, %p2337_p2 }
  0x3d   : > { %2347 = shalt.err (!%p2344_p11)
}
  0x3e   : > { %s3123_s8 = sld [smem:[#allocation30_spill]]  ;;  %s2537_s22 = smov [#allocation7]  }
  0x3f   : > { %s486_s19 = sshll.u32 %s2537_s22, 4  ;;  %s2538_s21 = smov [#allocation10]   ;;  %s487_s19 = int_to_ptr.vmem [resolvable:$true] %s486_s19 }
  0x40   : > { %s510_s6 = sshll.u32 %s2538_s21, 4  ;;  %s2359_s17 = scalar_lea.vmem %s487_s19, 16  ;;  %s511_s6 = int_to_ptr.vmem [resolvable:$true] %s510_s6 }
  0x41   : > { %p2360_p10 = scmp.ne.s32.totalorder %s487_s19, %s2359_s17  ;;  %s2366_s23 = scalar_lea.vmem %s487_s19, 32 }
  0x42   : > { %p2367_p0 = scmp.lt.s32.totalorder %s487_s19, %s487_s19  ;;  %p2368_p2 = scmp.lt.s32.totalorder %s2366_s23, %s2359_s17 }
  0x43   : > { %p2362_p12 = pnand %p2360_p10, %p2687_p7 }
  0x44   : > { %2167 = dma.hbm_to_vmem [thread:$0]  (!%p2679_p6), %s3123_s8, 256, %s2683_s24, [#allocation12], %s2535_s26, %s2535_s26, %s2536_s0  }
  0x45   : > { %p2363_p13 = pneg %p2362_p12  ;;  %p2369_p5 = por %p2368_p2, %p2367_p0 }
  0x47   : > { %p2370_p8 = pnand %p2369_p5, %p2363_p13 }
  0x49   : > { %2373 = shalt.err (!%p2370_p8)
}
  0x4a   : > { %s3124_s5 = sld [smem:[#allocation27_spill]]  ;;  %s2385_s26 = scalar_lea.vmem %s511_s6, 16 }
  0x4b   : > { %p2386_p9 = scmp.ne.s32.totalorder %s511_s6, %s2385_s26  ;;  %s2392_s0 = scalar_lea.vmem %s511_s6, 32 }
  0x4c   : > { %p2393_p12 = scmp.lt.s32.totalorder %s511_s6, %s511_s6  ;;  %p2394_p4 = scmp.lt.s32.totalorder %s2392_s0, %s2385_s26 }
  0x4d   : > { %p2388_p11 = pnand %p2386_p9, %p2687_p7 }
  0x4e   : > { %p2395_p1 = por %p2394_p4, %p2393_p12 }
  0x4f   : > { %p2389_p10 = pneg %p2388_p11 }
  0x50   : > { %2158 = dma.hbm_to_vmem [thread:$0]  (!%p2679_p6), %s3124_s5, 16, %s487_s19, [#allocation6]  }
  0x51   : > { %p2396_p0 = pnand %p2395_p1, %p2389_p10 }
  0x53   : > { %2399 = shalt.err (!%p2396_p0)
}
  0x54   : > { %s3125_s7 = sld [smem:[#allocation29_spill]]  ;;  %s2539_s22 = smov [#allocation13]  }
  0x55   : > { %s534_s19 = sshll.u32 %s2539_s22, 4  ;;  %s535_s19 = int_to_ptr.vmem [resolvable:$true] %s534_s19 }
  0x56   : > { %s2411_s21 = scalar_lea.vmem %s535_s19, 16  ;;  %s2418_s23 = scalar_lea.vmem %s535_s19, 32 }
  0x57   : > { %p2412_p13 = scmp.ne.s32.totalorder %s535_s19, %s2411_s21  ;;  %p2419_p8 = scmp.lt.s32.totalorder %s535_s19, %s535_s19 }
  0x58   : > { %p2420_p4 = scmp.lt.s32.totalorder %s2418_s23, %s2411_s21 }
  0x59   : > { %p2414_p2 = pnand %p2412_p13, %p2687_p7 }
  0x5a   : > { %2164 = dma.hbm_to_vmem [thread:$0]  (!%p2679_p6), %s3125_s7, 16, %s511_s6, [#allocation9]  }
  0x5b   : > { %p2415_p5 = pneg %p2414_p2  ;;  %p2421_p1 = por %p2420_p4, %p2419_p8 }
  0x5d   : > { %p2422_p9 = pnand %p2421_p1, %p2415_p5 }
  0x5f   : > { %2425 = shalt.err (!%p2422_p9)
}
  0x60   : > { %s3126_s9 = sld [smem:[#allocation31_spill]]  ;;  %s1905_s6 = sadd.s32 4294967294, %s2530_s30  }
  0x61   : > { %s2745_s2 = sadd.s32 1, %s2530_s30   ;;  %s70_s26 = sadd.s32 1, %s2526_s29 }
  0x62   : > { %3127 = sst [smem:[#allocation21_spill]] %s2745_s2  ;;  %s67_s25 = ssub.s32 %s2530_s30, %s2745_s2 }
  0x63   : > { %p68_p7 = scmp.eq.s32.totalorder %s67_s25, 0  ;;  %p77_p11 = scmp.ne.s32.totalorder %s2526_s29, %s2522_s28 }
  0x64   : > { %p78_p10 = scmp.eq.s32.totalorder %s2530_s30, 0  ;;  %p83_p12 = scmp.ne.s32.totalorder %s2522_s28, %s2518_s27 }
  0x65   : > { %s2756_s0 = scalar_select %p68_p7, %s2526_s29, %s70_s26  }
  0x66   : > { %2170 = dma.hbm_to_vmem [thread:$0]  (!%p2679_p6), %s3126_s9, 16, %s535_s19, [#allocation12]  }
  0x67   : > { %3128 = sst [smem:[#allocation22_spill]] %s2756_s0  ;;  %p2758_p0 = por %p78_p10, %p77_p11 }
  0x68   : > { %p3130_p13 = scmp.eq.s32.totalorder %s2663_s1, 0  ;;  %p443_p2 = scmp.eq.s32.totalorder %s2663_s1, 1 }
  0x69   : > { %p449_p5 = scmp.eq.s32.totalorder %s1905_s6, 1  ;;  %p2185_p8 = scmp.lt.s32.totalorder %s2530_s30, 2 }
  0x6a   : > { %p2764_p6 = por %p3130_p13, %p83_p12  ;;  %s576_s22 = sand.u32 1, %s2526_s29  }
  0x6b   : > { %p2771_p4 = por %p443_p2, %p77_p11  ;;  %p2775_p1 = por %p449_p5, %p83_p12 }
  0x6c   : > { %s3131_s18 = scalar_select %p2764_p6, 1, 0 }
  0x6d   : > { %s3132_s19 = scalar_select %p2771_p4, 1, 0 }
  0x6e   : > { %s3133_s21 = scalar_select %p2775_p1, 1, 0 }
  0x6f   : > { %s1914_s23 = sshll.u32 %s2530_s30, 4  ;;  %s579_s3 = scalar_lea.vmem [#allocation2], %s576_s22 }
  0x70   : > { %s586_s24 = sshll.u32 %s579_s3, 4  ;;  %s3134_s5 = sld [smem:[#allocation24_spill]]  ;;  %s587_s24 = int_to_ptr.vmem [resolvable:$true] %s586_s24 }
  0x71   : > { %p2787_p9 = pnand %p2185_p8, %p2758_p0  ;;  %s577_s8 = scalar_lea.sflag [#allocation3], %s576_s22 }
  0x73   : > { %p2428_p11 = pneg %p2787_p9 }
  0x76   : > { %s2783_s7 = scalar_lea.hbm %s3134_s5, %s1914_s23  ;;  %s2431_s25 = scalar_lea.hbm %s3134_s5, 32 }
  0x77   : > { %s2426_s9 = scalar_lea.hbm %s2783_s7, 16  ;;  %p2432_p13 = scmp.lt.s32.totalorder %s2783_s7, %s3134_s5 }
  0x78   : > { %p2427_p7 = scmp.ne.s32.totalorder %s2783_s7, %s2426_s9  ;;  %p2433_p0 = scmp.lt.s32.totalorder %s2431_s25, %s2426_s9 }
  0x7a   : > { %p2429_p10 = pnand %p2428_p11, %p2427_p7  ;;  %p2434_p2 = por %p2433_p0, %p2432_p13 }
  0x7c   : > { %p2430_p12 = pneg %p2429_p10 }
  0x7e   : > { %p2435_p5 = pnand %p2434_p2, %p2430_p12 }
  0x80   : > { %2438 = shalt.err (!%p2435_p5)
}
  0x81   : > { %s2439_s17 = scalar_lea.vmem %s587_s24, 16  ;;  %s2540_s22 = smov [#allocation2]  }
  0x82   : > { %p2440_p8 = scmp.ne.s32.totalorder %s587_s24, %s2439_s17  ;;  %s2444_s29 = sshll.u32 %s2540_s22, 4  ;;  %s2445_s29 = int_to_ptr.vmem [resolvable:$false] %s2444_s29 }
  0x83   : > { %s2446_s2 = scalar_lea.vmem %s2445_s29, 32  ;;  %p2447_p7 = scmp.lt.s32.totalorder %s587_s24, %s2445_s29 }
  0x84   : > { %p2442_p1 = pnand %p2440_p8, %p2428_p11  ;;  %p2448_p10 = scmp.lt.s32.totalorder %s2446_s2, %s2439_s17 }
  0x86   : > { %p2443_p4 = pneg %p2442_p1  ;;  %p2449_p6 = por %p2448_p10, %p2447_p7 }
  0x88   : > { %p2450_p3 = pnand %p2449_p6, %p2443_p4 }
  0x8a   : > { %2453 = shalt.err (!%p2450_p3)
}
  0x8b   : > { %2174 = dma.hbm_to_vmem [thread:$0]  (!%p2787_p9), %s2783_s7, 16, %s587_s24, %s577_s8  }
  0x8c   : > { %p3136_p12 = scmp.ne.s32.totalorder %s3118_s20, 0 }
  0x8d   : > { %s2808_s9 = sand.u32 (!%p3136_p12), 1, %s2522_s28   ;;  %p3137_p1 = scmp.ne.s32.totalorder (!%p3136_p12), %s3131_s18, 0 }
  0x8e   : > { %595 = sbr.rel (%p3136_p12) target bundleno = 3377 (0xd31), region = 92  ;;  %s598_s0 = scalar_lea.sflag (!%p3136_p12), [#allocation3], %s2808_s9 }
  0x8f   : > { %s600_s3 = scalar_lea.vmem (!%p3136_p12), [#allocation2], %s2808_s9 }
  0x93   : > { %2497 = dma.done.wait (%p3137_p1), %s598_s0, 16  }
  0x94   : > { %2499 = vsyncadd (%p3137_p1), %s598_s0, 4294967280  ;;  %p3138_p3 = scmp.eq.s32.totalorder %s2663_s1, 0 }
  0x96   : > { %2501 = dma.done.wait (%p3138_p3), [#allocation6], 32   ;;  %p3139_p6 = pmov %p3138_p3 }
  0x97   : > { %p3140_p4 = pmov %p3138_p3 }
  0x98   : > { %2503 = vsyncadd (%p3139_p6), [#allocation6], 4294967264 }
  0x99   : > { %2505 = dma.done.wait (%p3140_p4), [#allocation9], 272   ;;  %p3141_p9 = pmov %p3138_p3 }
  0x9a   : > { %p3142_p11 = pmov %p3138_p3 }
  0x9b   : > { %2507 = vsyncadd (%p3141_p9), [#allocation9], 4294967024 }
  0x9c   : > { %2509 = dma.done.wait (%p3142_p11), [#allocation12], 272   ;;  %p3143_p13 = pmov %p3138_p3 }
  0x9d   : > { %p680_p0 = scmp.lt.s32.totalorder %s2663_s1, 1  ;;  %s3144_s2 = sld [smem:[#allocation23_spill]]  ;;  %vm691_vm0 = vcmask 261120   ;;  %v2239_v5 = vld [vmem:[#allocation8 + $0x8] sm:$0xff]   ;;  %v2541_v6 = vmov 0.0   ;;  %v2241_v8 = vld [vmem:[#allocation8] sm:$0xff]   ;;  %v920_v53 = vlaneseq }
  0x9e   : > { %2511 = vsyncadd (%p3143_p13), [#allocation12], 4294967024  ;;  %s3145_s23 = sld [smem:[#allocation25_spill]]  ;;  %2008 = vmatprep.subr.bf16.mxu1 %v2541_v6  ;;  %2024 = vmatprep.subr.bf16.mxu0 %v2541_v6  ;;  %vm2542_vm1 = vmmov 0   ;;  %v1924_v18 = vld [vmem:[%s3087_s10] ss:$0 sm:$0xff] }
  0x9f   : > { %s681_s7 = scalar_select %p680_p0, %s2663_s1, 1  ;;  %2025 = vmatpush3.bf16.msra.mxu0 %v2239_v5  ;;  %2012 = vmatprep.mubr.msk.bf16.mxu1 %vm2542_vm1, %v2541_v6  ;;  %v1925_v20 = vld [vmem:[%s3088_s11] ss:$0 sm:$0xff]  ;;  %v2242_v23 = vld [vmem:[%s3081_s4 + $0x8] sm:$0xff]   ;;  %v1934_v26 = vld [vmem:[#allocation10] ss:$0 sm:$0xff] }
  0xa0   : > { %2026 = vmatprep.subr.bf16.mxu0 %v2541_v6  ;;  %2028 = vmatprep.mubr.msk.bf16.mxu0 %vm2542_vm1, %v2541_v6  ;;  %v2243_v25 = vld [vmem:[%s3081_s4] sm:$0xff]   ;;  %vm987_vm2 = vcmask 1043456   ;;  %vm925_vm3 = vcmask 64512   ;;  %v921_v55 = vshrl.u32 %v920_v53, 7  ;;  %s2545_s24 = smov 104   ;;  %vm1709_vm5 = vcmask 523264  }
  0xa1   : > { %s1923_s8 = sshll.u32 %s681_s7, 3  ;;  %v1926_v33 = vld [vmem:[#allocation5] ss:$0 sm:$0xff]  ;;  %v1930_v39 = vld [vmem:[#allocation7] ss:$0 sm:$0xff]  ;;  %s1922_s22 = sshll.u32 %s2808_s9, 3 }
  0xa2   : > { %v686_v54 = vld [vmem:[%s600_s3] sm:$0x1]  ;;  %v922_v56 = vsub.s32 0, %v921_v55  ;;  %s2544_s3 = smov 112   ;;  %s1964_s29 = sshll.u32 %s2663_s1, 7 }
  0xa3   : > { %s683_s18 = scalar_lea.vmem %s3144_s2, %s1923_s8  ;;  %2027 = vmatpush3.bf16.msra.mxu0 %v2241_v8  ;;  %vm687_vm4 = vcmp.eq.f32.partialorder %v686_v54, 0.0  ;;  %s3146_s8 = sld [smem:[#allocation32_spill]] }
  0xa4   : > { %v2833_v0 = vld [vmem:[%s683_s18] sm:$0xff]  ;;  %v2238_v4 = vld [vmem:[%s3145_s23 + $0x8] sm:$0xff]   ;;  %2038 = vmatprep.subr.bf16.mxu0 %v2541_v6  ;;  %s2543_s18 = smov 120   ;;  %v688_v57 = vsel %vm687_vm4, -1e+09, %v2541_v6  ;;  %s679_s20 = scalar_lea.vmem [#allocation14], %s1922_s22 }
  0xa5   : > { %v692_v1 = vsel %vm691_vm0, %v2833_v0, 0.0  ;;  %v697_v2 = vmul.f32 %v2833_v0, %v2833_v0  ;;  %2009 = vmatpush3.bf16.msra.mxu1 %v2238_v4  ;;  %v2240_v7 = vld [vmem:[%s3145_s23] sm:$0xff]   ;;  %v2908_v58 = vrot.slane %v688_v57, %v922_v56  ;;  %s1769_s2 = sshll.u32 %s679_s20, 4  ;;  %s1756_s1 = scalar_lea.sflag [#allocation4], %s2808_s9  ;;  %s3035_s2 = int_to_ptr.vmem [resolvable:$true] %s1769_s2 }
  0xa6   : > { %693 = vadd.xlane.f32.xlu0 %v692_v1  ;;  %2010 = vmatprep.subr.bf16.mxu1 %v2541_v6  ;;  %s2454_s25 = scalar_lea.vmem %s3035_s2, 128  ;;  %p3148_p5 = scmp.ne.s32.totalorder %s3132_s19, 0 }
  0xa7   : > { %v698_v3 = vsel %vm691_vm0, %v697_v2, 0.0  ;;  %p2455_p2 = scmp.ne.s32.totalorder %s3035_s2, %s2454_s25  ;;  %s2546_s26 = smov [#allocation14]  }
  0xa8   : > { %s2458_s17 = sshll.u32 %s2546_s26, 4  ;;  %s2459_s17 = int_to_ptr.vmem [resolvable:$false] %s2458_s17 }
  0xa9   : > { %2011 = vmatpush3.bf16.msra.mxu1 %v2240_v7  ;;  %p2456_p8 = pnand %p2455_p2, %p3148_p5  ;;  %s2460_s22 = scalar_lea.vmem %s2459_s17, 256 }
  0xaa   : > { %699 = vadd.xlane.f32.xlu0 %v698_v3  ;;  %2016 = vmatprep.subr.bf16.mxu1 %v2541_v6  ;;  %p2461_p10 = scmp.lt.s32.totalorder %s3035_s2, %s2459_s17  ;;  %p2462_p12 = scmp.lt.s32.totalorder %s2460_s22, %s2454_s25 }
  0xab   : > { %p2457_p7 = pneg %p2456_p8 }
  0xac   : > { %p2463_p1 = por %p2462_p12, %p2461_p10 }
  0xae   : > { %p2464_p3 = pnand %p2463_p1, %p2457_p7 }
 0x12f   : > { %v694_v9 = vpop.xlane.xlu0 %693 }
 0x130   : > { %v696_v10 = vmul.f32 0.03125, %v694_v9 }
 0x132   : > { %v702_v12 = vmul.f32 %v696_v10, %v696_v10  ;;  %v704_v16 = vsub.f32 %v2833_v0, %v696_v10 }
 0x133   : > { %v700_v11 = vpop.xlane.xlu0 %699 }
 0x134   : > { %v701_v13 = vmul.f32 0.03125, %v700_v11 }
 0x136   : > { %v703_v14 = vsub.f32 %v701_v13, %v702_v12 }
 0x138   : > { %v705_v15 = vadd.f32 1e-05, %v703_v14 }
 0x13a   : > { %2250 = vrsqrt.f32 %v705_v15 }
 0x147   : > { %v2251_v17 = vpop.eup %2250 }
 0x148   : > { %v707_v19 = vmul.f32 %v2251_v17, %v704_v16 }
 0x14a   : > { %v714_v21 = vmul.f32 %v1924_v18, %v707_v19 }
 0x14c   : > { %v721_v22 = vadd.f32 %v1925_v20, %v714_v21 }
 0x14e   : > { %v722_v24 = vpack.c.bf16 %v721_v22, %v721_v22 }
 0x150   : > { %2013 = vmatmul.mubr.msk.bf16.vlgmr.msra.gmra.mxu1 %vm691_vm0, %v722_v24  ;;  %2029 = vmatmul.mubr.msk.bf16.vlgmr.msra.gmra.mxu0 %vm691_vm0, %v722_v24 }
 0x151   : > { %2017 = vmatpush3.bf16.msra.mxu1 %v2242_v23  ;;  %2020 = vmatprep.mubr.msk.bf16.mxu1 %vm2542_vm1, %v2541_v6  ;;  %v1148_v23 = vld [vmem:[#allocation11 + $0x4] sm:$0xf] }
 0x152   : > { %2018 = vmatprep.subr.bf16.mxu1 %v2541_v6  ;;  %2040 = vmatprep.mubr.msk.bf16.mxu0 %vm2542_vm1, %v2541_v6 }
 0x155   : > { %2019 = vmatpush3.bf16.msra.mxu1 %v2243_v25 }
 0x156   : > { %2032 = vmatprep.subr.bf16.mxu1 %v2541_v6 }
 0x158   : > { %2021 = vmatmul.mubr.msk.bf16.vlgmr.msra.gmra.mxu1 %vm691_vm0, %v722_v24  ;;  %v1153_v24 = vsel %vm987_vm2, %v1148_v23, 0 }
 0x159   : > { %2034 = vmatprep.mubr.msk.bf16.mxu1 %vm2542_vm1, %v2541_v6 }
 0x210   : > { %v783_v27 = vpop.f32.mrf.mxu1  ;;  %v910_v28 = vpop.f32.mrf.mxu0 }
 0x211   : > { %v911_v29 = vadd.f32 %v1934_v26, %v910_v28  ;;  %v784_v40 = vadd.f32 %v1926_v33, %v783_v27 }
 0x212   : > { %v2014_v30 = vpop.f32.mrf.mxu1  ;;  %v2030_v31 = vpop.f32.mrf.mxu0 }
 0x213   : > { %v2880_v32 = vpack.c.bf16 %v911_v29, %v911_v29  ;;  %v789_v44 = vmul.f32 0.35355338, %v784_v40  ;;  %v1032_v29 = vld [vmem:[#allocation11] sm:$0xf] }
 0x214   : > { %v786_v34 = vpop.f32.mrf.mxu1  ;;  %v913_v35 = vpop.f32.mrf.mxu0  ;;  %v1199_v33 = vsel %vm987_vm2, %v1032_v29, 0 }
 0x215   : > { %v989_v36 = vsel %vm987_vm2, %v2880_v32, 0  ;;  %v2891_v49 = vpack.c.bf16 %v789_v44, %v789_v44 }
 0x216   : > { %v2015_v37 = vpop.f32.mrf.mxu1  ;;  %v2031_v38 = vpop.f32.mrf.mxu0  ;;  %2039 = vmatpush3.bf16.msra.mxu0 %v989_v36 }
 0x217   : > { %2050 = vmatprep.subr.bf16.mxu0 %v2541_v6 }
 0x218   : > { %v847_v41 = vpop.f32.mrf.mxu1 }
 0x219   : > { %v848_v42 = vadd.f32 %v1930_v39, %v847_v41 }
 0x21a   : > { %v2022_v43 = vpop.f32.mrf.mxu1 }
 0x21b   : > { %v2885_v45 = vpack.c.bf16 %v848_v42, %v848_v42 }
 0x21c   : > { %v850_v46 = vpop.f32.mrf.mxu1 }
 0x21d   : > { %1037 = vrot.lane.b32.xlu1 %v2885_v45, %s2543_s18  ;;  %v930_v47 = vsel %vm925_vm3, %v2885_v45, 0 }
 0x21e   : > { %v2023_v48 = vpop.f32.mrf.mxu1  ;;  %2033 = vmatpush3.bf16.xpose.msra.mxu1 %v930_v47 }
 0x21f   : > { %2044 = vmatprep.subr.bf16.mxu1 %v2541_v6 }
 0x221   : > { %1034 = vrot.lane.b32.xlu1 %v2891_v49, %s2543_s18 }
 0x225   : > { %2035 = vmatmul.mubr.msk.bf16.vlgmr.msra.gmra.mxu1 %vm925_vm3, %v2891_v49 }
 0x226   : > { %2046 = vmatprep.mubr.msk.bf16.mxu1 %vm2542_vm1, %v2541_v6 }
 0x28f   : > { %v1038_v50 = vpop.permute.xlu1 %1037 }
 0x290   : > { %v1043_v51 = vsel %vm925_vm3, %v1038_v50, 0 }
 0x291   : > { %2045 = vmatpush3.bf16.xpose.msra.mxu1 %v1043_v51 }
 0x292   : > { %2056 = vmatprep.subr.bf16.mxu1 %v2541_v6 }
 0x293   : > { %v1035_v52 = vpop.permute.xlu1 %1034 }
 0x298   : > { %2047 = vmatmul.mubr.msk.bf16.vlgmr.msra.gmra.mxu1 %vm925_vm3, %v1035_v52 }
 0x299   : > { %2058 = vmatprep.mubr.msk.bf16.mxu1 %vm2542_vm1, %v2541_v6  ;;  %2057 = vmatpush3.bf16.msra.mxu1 %v1153_v24 }
 0x29a   : > { %2068 = vmatprep.subr.bf16.mxu1 %v2541_v6 }
 0x2e5   : > { %v966_v59 = vpop.f32.mrf.mxu1 }
 0x2e6   : > { %v967_v60 = vadd.f32 %v966_v59, %v2908_v58 }
 0x2e7   : > { %v2036_v61 = vpop.f32.mrf.mxu1 }
 0x2e8   : > { %v972_v62 = vsel %vm925_vm3, %v967_v60, -inf }
 0x2e9   : > { %973 = vmax.xlane.f32.xlu0 %v972_v62  ;;  %v969_v63 = vpop.f32.mrf.mxu1 }
 0x2eb   : > { %v2037_v1 = vpop.f32.mrf.mxu1 }
 0x358   : > { %v1079_v2 = vpop.f32.mrf.mxu1 }
 0x359   : > { %v1080_v3 = vadd.f32 %v1079_v2, %v2908_v58 }
 0x35a   : > { %v2048_v4 = vpop.f32.mrf.mxu1 }
 0x35b   : > { %v1085_v5 = vsel %vm925_vm3, %v1080_v3, -inf }
 0x35c   : > { %1086 = vmax.xlane.f32.xlu1 %v1085_v5  ;;  %v1082_v7 = vpop.f32.mrf.mxu1 }
 0x35e   : > { %v2049_v8 = vpop.f32.mrf.mxu1 }
 0x36d   : > { %1241 = vrot.lane.b32.xlu1 %v2891_v49, %s2544_s3 }
 0x372   : > { %v974_v9 = vpop.xlane.xlu0 %973 }
 0x373   : > { %v975_v10 = vsub.f32 %v967_v60, %v974_v9 }
 0x375   : > { %v976_v11 = vmul.f32 1.442695, %v975_v10 }
 0x377   : > { %2252 = vpow2.f32 %v976_v11 }
 0x384   : > { %v2253_v12 = vpop.eup %2252 }
 0x385   : > { %v978_v13 = vsel %vm925_vm3, %v2253_v12, 0.0 }
 0x386   : > { %979 = vadd.xlane.f32.xlu0 %v978_v13 }
 0x3e5   : > { %v1087_v14 = vpop.xlane.xlu1 %1086 }
 0x3e6   : > { %v1088_v15 = vsub.f32 %v1080_v3, %v1087_v14 }
 0x3e8   : > { %v1089_v16 = vmul.f32 1.442695, %v1088_v15 }
 0x3e9   : > { %v1242_v47 = vpop.permute.xlu1 %1241 }
 0x3ea   : > { %2254 = vpow2.f32 %v1089_v16 }
 0x3f7   : > { %v2255_v17 = vpop.eup %2254 }
 0x3f8   : > { %v1091_v18 = vsel %vm925_vm3, %v2255_v17, 0.0 }
 0x3f9   : > { %1092 = vadd.xlane.f32.xlu0 %v1091_v18 }
 0x40f   : > { %v980_v19 = vpop.xlane.xlu0 %979  ;;  %1098 = vrot.lane.b32.xlu0 %v2880_v32, %s2543_s18 }
 0x410   : > { %2256 = vrcp.f32 %v980_v19 }
 0x413   : > { %1243 = vrot.lane.b32.xlu0 %v2885_v45, %s2544_s3 }
 0x41d   : > { %v2257_v20 = vpop.eup %2256 }
 0x41e   : > { %v982_v21 = vmul.f32 %v2257_v20, %v2253_v12 }
 0x420   : > { %v983_v22 = vpack.c.bf16 %v982_v21, %v982_v21 }
 0x422   : > { %2041 = vmatmul.mubr.msk.bf16.vlgmr.msra.gmra.mxu0 %vm925_vm3, %v983_v22 }
 0x423   : > { %2052 = vmatprep.mubr.msk.bf16.mxu0 %vm2542_vm1, %v2541_v6 }
 0x482   : > { %v1093_v25 = vpop.xlane.xlu0 %1092 }
 0x483   : > { %2258 = vrcp.f32 %v1093_v25 }
 0x486   : > { %v1099_v26 = vpop.permute.xlu0 %1098 }
 0x487   : > { %v1104_v27 = vsel %vm987_vm2, %v1099_v26, 0 }
 0x488   : > { %2051 = vmatpush3.bf16.msra.mxu0 %v1104_v27 }
 0x489   : > { %2062 = vmatprep.subr.bf16.mxu0 %v2541_v6 }
 0x48a   : > { %v1244_v39 = vpop.permute.xlu0 %1243 }
 0x48b   : > { %v1249_v43 = vsel %vm925_vm3, %v1244_v39, 0 }
 0x490   : > { %v2259_v28 = vpop.eup %2258 }
 0x491   : > { %v1095_v30 = vmul.f32 %v2259_v28, %v2255_v17 }
 0x493   : > { %v1096_v31 = vpack.c.bf16 %v1095_v30, %v1095_v30 }
 0x495   : > { %2053 = vmatmul.mubr.msk.bf16.vlgmr.msra.gmra.mxu0 %vm925_vm3, %v1096_v31 }
 0x496   : > { %2063 = vmatpush3.bf16.msra.mxu0 %v1199_v33  ;;  %2064 = vmatprep.mubr.msk.bf16.mxu0 %vm2542_vm1, %v2541_v6 }
 0x497   : > { %2074 = vmatprep.subr.bf16.mxu0 %v2541_v6 }
 0x4e2   : > { %v1025_v34 = vpop.f32.mrf.mxu0 }
 0x4e3   : > { %v1031_v35 = vpack.c.bf16 %v1025_v34, %v1025_v34 }
 0x4e4   : > { %v2042_v36 = vpop.f32.mrf.mxu0 }
 0x4e5   : > { %2065 = vmatmul.mubr.msk.bf16.vlgmr.msra.gmra.mxu0 %vm925_vm3, %v1031_v35 }
 0x4e6   : > { %v1028_v37 = vpop.f32.mrf.mxu0  ;;  %2076 = vmatprep.mubr.msk.bf16.mxu0 %vm2542_vm1, %v2541_v6 }
 0x4e7   : > { %v1513_v37 = vld [vmem:[#allocation11 + $0xc] sm:$0xf] }
 0x4e8   : > { %v2043_v38 = vpop.f32.mrf.mxu0 }
 0x4e9   : > { %v1518_v38 = vsel %vm987_vm2, %v1513_v37, 0 }
 0x555   : > { %v1140_v40 = vpop.f32.mrf.mxu0 }
 0x556   : > { %v1146_v41 = vpack.c.bf16 %v1140_v40, %v1140_v40 }
 0x557   : > { %v2054_v42 = vpop.f32.mrf.mxu0 }
 0x558   : > { %2059 = vmatmul.mubr.msk.bf16.vlgmr.msra.gmra.mxu1 %vm925_vm3, %v1146_v41 }
 0x559   : > { %2069 = vmatpush3.bf16.xpose.msra.mxu1 %v1249_v43  ;;  %v1143_v44 = vpop.f32.mrf.mxu0  ;;  %2070 = vmatprep.mubr.msk.bf16.mxu1 %vm2542_vm1, %v2541_v6 }
 0x55a   : > { %2080 = vmatprep.subr.bf16.mxu1 %v2541_v6 }
 0x55b   : > { %v2055_v46 = vpop.f32.mrf.mxu0 }
 0x560   : > { %2071 = vmatmul.mubr.msk.bf16.vlgmr.msra.gmra.mxu1 %vm925_vm3, %v1242_v47 }
 0x561   : > { %2082 = vmatprep.mubr.msk.bf16.mxu1 %vm2542_vm1, %v2541_v6 }
 0x5a5   : > { %v2945_v48 = vpop.f32.mrf.mxu0 }
 0x5a7   : > { %v2066_v50 = vpop.f32.mrf.mxu0 }
 0x5a9   : > { %v1238_v51 = vpop.f32.mrf.mxu0 }
 0x5ab   : > { %v2067_v52 = vpop.f32.mrf.mxu0 }
 0x618   : > { %v2947_v53 = vpop.f32.mrf.mxu1 }
 0x619   : > { %v1236_v34 = vadd.f32 %v2945_v48, %v2947_v53  ;;  %v1950_v53 = vld [vmem:[#allocation13] ss:$0 sm:$0xff] }
 0x61a   : > { %v2060_v54 = vpop.f32.mrf.mxu1 }
 0x61c   : > { %v1192_v55 = vpop.f32.mrf.mxu1 }
 0x61e   : > { %v2061_v56 = vpop.f32.mrf.mxu1 }
 0x620   : > { %v1285_v57 = vpop.f32.mrf.mxu1 }
 0x621   : > { %v1286_v59 = vadd.f32 %v1285_v57, %v2908_v58 }
 0x622   : > { %v2072_v60 = vpop.f32.mrf.mxu1 }
 0x623   : > { %v1291_v61 = vsel %vm925_vm3, %v1286_v59, -inf }
 0x624   : > { %1292 = vmax.xlane.f32.xlu0 %v1291_v61  ;;  %v1288_v62 = vpop.f32.mrf.mxu1 }
 0x626   : > { %v2073_v63 = vpop.f32.mrf.mxu1 }
 0x63a   : > { %1303 = vrot.lane.b32.xlu0 %v2880_v32, %s2544_s3 }
 0x63e   : > { %1401 = vrot.lane.b32.xlu0 %v2891_v49, %s2545_s24 }
 0x6ad   : > { %v1293_v1 = vpop.xlane.xlu0 %1292 }
 0x6ae   : > { %v1294_v2 = vsub.f32 %v1286_v59, %v1293_v1  ;;  %v2244_v1 = vld [vmem:[%s3091_s14 + $0x8] sm:$0xff]  }
 0x6b0   : > { %v1295_v3 = vmul.f32 1.442695, %v1294_v2  ;;  %v2245_v2 = vld [vmem:[%s3091_s14] sm:$0xff]  }
 0x6b1   : > { %v1304_v4 = vpop.permute.xlu0 %1303 }
 0x6b2   : > { %2260 = vpow2.f32 %v1295_v3  ;;  %v1309_v5 = vsel %vm987_vm2, %v1304_v4, 0  ;;  %v2247_v3 = vld [vmem:[%s3093_s16 + $0x10] sm:$0xff]  }
 0x6b3   : > { %2075 = vmatpush3.bf16.msra.mxu0 %v1309_v5 }
 0x6b4   : > { %2086 = vmatprep.subr.bf16.mxu0 %v2541_v6 }
 0x6b5   : > { %v1402_v14 = vpop.permute.xlu0 %1401 }
 0x6bf   : > { %v2261_v7 = vpop.eup %2260 }
 0x6c0   : > { %v1297_v8 = vsel %vm925_vm3, %v2261_v7, 0.0 }
 0x6c1   : > { %1298 = vadd.xlane.f32.xlu1 %v1297_v8 }
 0x6d2   : > { %1403 = vrot.lane.b32.xlu1 %v2885_v45, %s2545_s24  ;;  %v1353_v45 = vld [vmem:[#allocation11 + $0x8] sm:$0xf] }
 0x6d3   : > { %v1358_v15 = vsel %vm987_vm2, %v1353_v45, 0  ;;  %v1952_v45 = vld [vmem:[%s3090_s13] ss:$0 sm:$0xff] }
 0x6d4   : > { %2081 = vmatpush3.bf16.msra.mxu1 %v1358_v15 }
 0x6d5   : > { %2092 = vmatprep.subr.bf16.mxu1 %v2541_v6 }
 0x74a   : > { %v1299_v9 = vpop.xlane.xlu1 %1298 }
 0x74b   : > { %2262 = vrcp.f32 %v1299_v9 }
 0x74e   : > { %v1404_v11 = vpop.permute.xlu1 %1403 }
 0x74f   : > { %v1409_v13 = vsel %vm925_vm3, %v1404_v11, 0 }
 0x758   : > { %v2263_v49 = vpop.eup %2262 }
 0x759   : > { %v1301_v10 = vmul.f32 %v2263_v49, %v2261_v7 }
 0x75b   : > { %v1302_v12 = vpack.c.bf16 %v1301_v10, %v1301_v10 }
 0x75d   : > { %2077 = vmatmul.mubr.msk.bf16.vlgmr.msra.gmra.mxu0 %vm925_vm3, %v1302_v12 }
 0x75e   : > { %2087 = vmatpush3.bf16.xpose.msra.mxu0 %v1409_v13  ;;  %2088 = vmatprep.mubr.msk.bf16.mxu0 %vm2542_vm1, %v2541_v6  ;;  %v1951_v13 = vld [vmem:[%s3089_s12] ss:$0 sm:$0xff] }
 0x75f   : > { %2098 = vmatprep.subr.bf16.mxu0 %v2541_v6 }
 0x765   : > { %2089 = vmatmul.mubr.msk.bf16.vlgmr.msra.gmra.mxu0 %vm925_vm3, %v1402_v14 }
 0x766   : > { %2100 = vmatprep.mubr.msk.bf16.mxu0 %vm2542_vm1, %v2541_v6  ;;  %2099 = vmatpush3.bf16.msra.mxu0 %v1518_v38 }
 0x767   : > { %2112 = vmatprep.subr.bf16.mxu0 %v2541_v6 }
 0x81d   : > { %v1345_v16 = vpop.f32.mrf.mxu0 }
 0x81e   : > { %v1351_v17 = vpack.c.bf16 %v1345_v16, %v1345_v16 }
 0x81f   : > { %v2078_v18 = vpop.f32.mrf.mxu0 }
 0x820   : > { %2083 = vmatmul.mubr.msk.bf16.vlgmr.msra.gmra.mxu1 %vm925_vm3, %v1351_v17  ;;  %v2248_v18 = vld [vmem:[%s3093_s16 + $0x8] sm:$0xff]  }
 0x821   : > { %v1348_v19 = vpop.f32.mrf.mxu0  ;;  %2094 = vmatprep.mubr.msk.bf16.mxu1 %vm2542_vm1, %v2541_v6 }
 0x822   : > { %v2249_v19 = vld [vmem:[%s3093_s16] sm:$0xff]  }
 0x823   : > { %v2079_v20 = vpop.f32.mrf.mxu0 }
 0x824   : > { %v1953_v20 = vld [vmem:[%s3092_s15] ss:$0 sm:$0xff] }
 0x825   : > { %v1445_v21 = vpop.f32.mrf.mxu0 }
 0x826   : > { %v1446_v22 = vadd.f32 %v1445_v21, %v2908_v58 }
 0x827   : > { %v2090_v23 = vpop.f32.mrf.mxu0 }
 0x828   : > { %v1451_v24 = vsel %vm925_vm3, %v1446_v22, -inf }
 0x829   : > { %1452 = vmax.xlane.f32.xlu0 %v1451_v24  ;;  %v1448_v25 = vpop.f32.mrf.mxu0 }
 0x82b   : > { %v2091_v26 = vpop.f32.mrf.mxu0 }
 0x83f   : > { %1463 = vrot.lane.b32.xlu0 %v2880_v32, %s2545_s24  ;;  %s3147_s24 = sld [smem:[#allocation33_spill]] }
 0x845   : > { %s3033_s6 = scalar_lea.hbm %s3147_s24, %s1964_s29 }
 0x8b2   : > { %v1453_v27 = vpop.xlane.xlu0 %1452 }
 0x8b3   : > { %v1454_v28 = vsub.f32 %v1446_v22, %v1453_v27 }
 0x8b5   : > { %v1455_v29 = vmul.f32 1.442695, %v1454_v28 }
 0x8b6   : > { %v1464_v30 = vpop.permute.xlu0 %1463 }
 0x8b7   : > { %2264 = vpow2.f32 %v1455_v29  ;;  %v1469_v31 = vsel %vm987_vm2, %v1464_v30, 0 }
 0x8b8   : > { %2093 = vmatpush3.bf16.msra.mxu1 %v1469_v31 }
 0x8b9   : > { %2104 = vmatprep.subr.bf16.mxu1 %v2541_v6 }
 0x8c4   : > { %v2265_v58 = vpop.eup %2264 }
 0x8c5   : > { %v1457_v33 = vsel %vm925_vm3, %v2265_v58, 0.0 }
 0x8c6   : > { %1458 = vadd.xlane.f32.xlu1 %v1457_v33 }
 0x8e0   : > { %v1394_v35 = vpop.f32.mrf.mxu1 }
 0x8e1   : > { %v1400_v36 = vadd.f32 %v1394_v35, %v1236_v34 }
 0x8e2   : > { %v2084_v32 = vpop.f32.mrf.mxu1 }
 0x8e4   : > { %v1397_v39 = vpop.f32.mrf.mxu1 }
 0x8e6   : > { %v2085_v40 = vpop.f32.mrf.mxu1 }
 0x94f   : > { %v1459_v41 = vpop.xlane.xlu1 %1458 }
 0x950   : > { %2266 = vrcp.f32 %v1459_v41 }
 0x95d   : > { %v2267_v42 = vpop.eup %2266 }
 0x95e   : > { %v1461_v43 = vmul.f32 %v2267_v42, %v2265_v58 }
 0x960   : > { %v1462_v44 = vpack.c.bf16 %v1461_v43, %v1461_v43 }
 0x962   : > { %2095 = vmatmul.mubr.msk.bf16.vlgmr.msra.gmra.mxu1 %vm925_vm3, %v1462_v44 }
 0x963   : > { %2108 = vmatprep.mubr.msk.bf16.mxu1 %vm2542_vm1, %v2541_v6  ;;  %2105 = vmatpush3.bf16.msra.mxu1 %v2244_v1 }
 0x964   : > { %2106 = vmatprep.subr.bf16.mxu1 %v2541_v6 }
 0x967   : > { %2107 = vmatpush3.bf16.msra.mxu1 %v2245_v2 }
 0xa22   : > { %v1505_v46 = vpop.f32.mrf.mxu1 }
 0xa23   : > { %v1511_v47 = vpack.c.bf16 %v1505_v46, %v1505_v46 }
 0xa24   : > { %v2096_v48 = vpop.f32.mrf.mxu1 }
 0xa25   : > { %2101 = vmatmul.mubr.msk.bf16.vlgmr.msra.gmra.mxu0 %vm925_vm3, %v1511_v47 }
 0xa26   : > { %v1508_v50 = vpop.f32.mrf.mxu1  ;;  %2120 = vmatprep.mubr.msk.bf16.mxu0 %vm2542_vm1, %v2541_v6 }
 0xa28   : > { %v2097_v51 = vpop.f32.mrf.mxu1 }
 0xae5   : > { %v1554_v52 = vpop.f32.mrf.mxu0 }
 0xae6   : > { %v1560_v54 = vadd.f32 %v1554_v52, %v1400_v36 }
 0xae7   : > { %v2102_v55 = vpop.f32.mrf.mxu0 }
 0xae8   : > { %v1568_v56 = vadd.f32 %v1950_v53, %v1560_v54 }
 0xae9   : > { %v1557_v57 = vpop.f32.mrf.mxu0 }
 0xaea   : > { %v1569_v59 = vadd.f32 %v1568_v56, %v2833_v0  ;;  %v2246_v0 = vld [vmem:[%s3093_s16 + $0x18] sm:$0xff]  }
 0xaeb   : > { %v2103_v60 = vpop.f32.mrf.mxu0  ;;  %2113 = vmatpush3.bf16.msra.mxu0 %v2246_v0 }
 0xaec   : > { %v1572_v61 = vsel %vm691_vm0, %v1569_v59, 0.0  ;;  %v1576_v62 = vmul.f32 %v1569_v59, %v1569_v59  ;;  %2114 = vmatprep.subr.bf16.mxu0 %v2541_v6 }
 0xaed   : > { %1573 = vadd.xlane.f32.xlu1 %v1572_v61 }
 0xaee   : > { %v1577_v63 = vsel %vm691_vm0, %v1576_v62, 0.0 }
 0xaef   : > { %2115 = vmatpush3.bf16.msra.mxu0 %v2247_v3 }
 0xaf0   : > { %2116 = vmatprep.subr.bf16.mxu0 %v2541_v6 }
 0xaf1   : > { %1578 = vadd.xlane.f32.xlu1 %v1577_v63 }
 0xaf3   : > { %2117 = vmatpush3.bf16.msra.mxu0 %v2248_v18 }
 0xaf4   : > { %2118 = vmatprep.subr.bf16.mxu0 %v2541_v6  ;;  %v1957_v6 = vld [vmem:[%s3146_s8] ss:$0 sm:$0xff] }
 0xaf7   : > { %2119 = vmatpush3.bf16.msra.mxu0 %v2249_v19 }
 0xb76   : > { %v1574_v4 = vpop.xlane.xlu1 %1573 }
 0xb77   : > { %v1575_v5 = vmul.f32 0.03125, %v1574_v4 }
 0xb79   : > { %v1581_v8 = vmul.f32 %v1575_v5, %v1575_v5  ;;  %v1583_v11 = vsub.f32 %v1569_v59, %v1575_v5 }
 0xb7a   : > { %v1579_v7 = vpop.xlane.xlu1 %1578 }
 0xb7b   : > { %v1580_v9 = vmul.f32 0.03125, %v1579_v7 }
 0xb7d   : > { %v1582_v49 = vsub.f32 %v1580_v9, %v1581_v8 }
 0xb7f   : > { %v1584_v10 = vadd.f32 1e-05, %v1582_v49 }
 0xb81   : > { %2268 = vrsqrt.f32 %v1584_v10 }
 0xb8e   : > { %v2269_v12 = vpop.eup %2268 }
 0xb8f   : > { %v1586_v14 = vmul.f32 %v2269_v12, %v1583_v11 }
 0xb91   : > { %v1593_v15 = vmul.f32 %v1951_v13, %v1586_v14 }
 0xb93   : > { %v1600_v16 = vadd.f32 %v1952_v45, %v1593_v15 }
 0xb95   : > { %v1601_v17 = vpack.c.bf16 %v1600_v16, %v1600_v16 }
 0xb97   : > { %2109 = vmatmul.mubr.msk.bf16.vlgmr.msra.gmra.mxu1 %vm691_vm0, %v1601_v17 }
 0xc57   : > { %v1662_v21 = vpop.f32.mrf.mxu1 }
 0xc58   : > { %v1663_v22 = vadd.f32 %v1953_v20, %v1662_v21 }
 0xc59   : > { %v2110_v23 = vpop.f32.mrf.mxu1 }
 0xc5a   : > { %v1668_v24 = vmax.f32 %v1663_v22, 0.0 }
 0xc5b   : > { %v1665_v25 = vpop.f32.mrf.mxu1 }
 0xc5c   : > { %v1669_v26 = vpack.c.bf16 %v1668_v24, %v1668_v24 }
 0xc5d   : > { %v2111_v27 = vpop.f32.mrf.mxu1 }
 0xc5e   : > { %2121 = vmatmul.mubr.msk.bf16.vlgmr.msra.gmra.mxu0 %vm1709_vm5, %v1669_v26 }
 0xd1e   : > { %v1747_v28 = vpop.f32.mrf.mxu0 }
 0xd1f   : > { %v1748_v29 = vadd.f32 %v1957_v6, %v1747_v28 }
 0xd20   : > { %v2122_v30 = vpop.f32.mrf.mxu0 }
 0xd21   : > { %v1753_v31 = vadd.f32 %v1748_v29, %v1569_v59 }
 0xd22   : > { %v1750_v58 = vpop.f32.mrf.mxu0 }
 0xd23   : > { %1754 = vst.msk [vmem:[%s679_s20] sm:$0xff] %vm691_vm0, %v1753_v31 }
 0xd24   : > { %v2123_v33 = vpop.f32.mrf.mxu0 }
 0xd25   : > { %2467 = shalt.err (!%p2464_p3)
}
 0xd26   : > { %s2468_s0 = scalar_lea.hbm %s3033_s6, 128  ;;  %s2472_s8 = scalar_lea.hbm %s3147_s24, 256 }
 0xd27   : > { %p2469_p6 = scmp.ne.s32.totalorder %s3033_s6, %s2468_s0  ;;  %p2473_p11 = scmp.lt.s32.totalorder %s3033_s6, %s3147_s24 }
 0xd28   : > { %p2474_p13 = scmp.lt.s32.totalorder %s2472_s8, %s2468_s0 }
 0xd29   : > { %p2470_p4 = pnand %p2469_p6, %p3148_p5 }
 0xd2a   : > { %p2475_p0 = por %p2474_p13, %p2473_p11 }
 0xd2b   : > { %p2471_p9 = pneg %p2470_p4 }
 0xd2d   : > { %p2476_p2 = pnand %p2475_p0, %p2471_p9 }
 0xd2f   : > { %2479 = shalt.err (!%p2476_p2)
}
 0xd30   : > { %2150 = dma.vmem_to_hbm [thread:$0]  (%p3148_p5), %s3035_s2, 128, %s3033_s6, %s1756_s1  }
 0xd31 PF: > { %s1781_s18 = sand.u32 1, %s2518_s27   ;;  %p3149_p8 = scmp.ne.s32.totalorder %s3133_s21, 0 }
 0xd32   : > { %p3150_p7 = scmp.ge.s32.totalorder %s2530_s30, 2  ;;  %s1782_s3 = scalar_lea.sflag [#allocation4], %s1781_s18 }
 0xd34   : > { %p2176_p10 = pnand %p3150_p7, %p3149_p8 }
 0xd36   : > { %p2177_p12 = pneg %p2176_p10 }
 0xd38   : > { %2513 = dma.done.wait (%p2177_p12), %s1782_s3, 128  }
 0xd39   : > { %2515 = vsyncadd (%p2177_p12), %s1782_s3, 4294967168  ;;  %s3151_s30 = sld [smem:[#allocation21_spill]]  ;;  %s3154_s27 = smov %s2522_s28 }
 0xd3a   : > { %s3152_s25 = sld [smem:[#allocation20_spill]] }
 0xd3b   : > { %s3153_s29 = sld [smem:[#allocation22_spill]] }
 0xd3f   : > { %p34_p1 = scmp.ge.s32.totalorder %s3151_s30, 4  }
 0xd40   : > { %s3155_s28 = smov %s3152_s25 }
 0xd41   :  { %36 = sbr.rel (!%p34_p1) target bundleno = 20 (0x14), region = 167 }
 0xd46   :  { %1787 = vsyncpa [#allocation3], 1 }
 0xd47   :  { %1789 = vsyncpa [#allocation3 + $0x1], 1 }
 0xd48   :  { %1790 = vsyncpa [#allocation6], 1 }
 0xd49   :  { %1791 = vsyncpa [#allocation9], 1 }
 0xd4a   :  { %1792 = vsyncpa [#allocation12], 1 }
 0xd4b   :  { %1793 = vsyncpa [#allocation4], 1 }
 0xd4c   :  { %1795 = vsyncpa [#allocation4 + $0x1], 1 }

</bundles_post_ra>
